<compile_context>
chip_gen: v7x
topology: tpu7x:2x2x1
jax: 0.10.0
libtpu: 0.0.40
codegen_flags: <defaults>
</compile_context>

<pallas_src>
import jax
import jax.numpy as jnp
from jax.experimental import pallas as pl
from jax.experimental.pallas import tpu as pltpu

X_DIM = 4
TIME_STEPS = 5
INPUT_DIM = 64
HIDDEN_DIM = 64
NUM_LAYERS = 2
BATCH = 4

H = HIDDEN_DIM
G = 4 * HIDDEN_DIM              # 256 gate columns per LSTM layer
K_IN = TIME_STEPS * X_DIM       # 20 pre_fc input features
KBD = 128                       # padded block-diag contraction dim (5*20 data + 5 bias + pad)

# Row offsets inside the packed (320, 256) gate-weight slab.
_OFF_WIH0 = 0
_OFF_WHH0 = 64
_OFF_WIH1 = 128
_OFF_WHH1 = 192
_OFF_WF1 = 256
# Rows of the (16, 256) tail slab: biases + tiny fc3/fc4 weights.
_ROW_B0, _ROW_B1, _ROW_BF1, _ROW_BF2, _ROW_BF3, _ROW_BF4, _ROW_WF4 = range(7)
_ROW_WF3T = 8                   # rows 8:16 hold wf3^T (8, 64)


def clf_lstm_kernel(xbd_ref, w256_ref, wpre_ref, wf2_ref, tail_ref, out_ref, xproj_ref):
    f32 = jnp.float32
    TB = xbd_ref.shape[0]       # TIME_STEPS * Bp
    B = TB // TIME_STEPS        # padded batch (multiple of 8)

    # ---- pre_fc + ReLU, time-major (bias folded into the block-diag weight) ----
    pre_tm = jnp.maximum(
        jnp.dot(xbd_ref[...], wpre_ref[...], preferred_element_type=f32), 0.0)  # (5*B, 64)

    # ---- all 5 layer-0 input projections in ONE matmul; stage in VMEM ----------
    b0_b = jnp.broadcast_to(tail_ref[_ROW_B0:_ROW_B0 + 1, :], (TB, G))
    xproj_ref[...] = (
        jnp.dot(pre_tm, w256_ref[_OFF_WIH0:_OFF_WIH0 + 64, :],
                preferred_element_type=f32) + b0_b)

    # Hoisted bias broadcast for layer 1 (JAX does not CSE broadcast_in_dim).
    b1_b = jnp.broadcast_to(tail_ref[_ROW_B1:_ROW_B1 + 1, :], (B, G))

    # Gate columns repacked host-side to [i, f, o, g]; activation slices are
    # per-vreg so none straddles the 128-lane tile boundary.
    def gate_act(gates, c):
        sig_if = jax.nn.sigmoid(gates[:, 0:2 * H])      # lanes   0:128 (one vreg)
        o = jax.nn.sigmoid(gates[:, 2 * H:3 * H])       # lanes 128:192
        g = jnp.tanh(gates[:, 3 * H:4 * H])             # lanes 192:256
        i = sig_if[:, 0:H]
        f = sig_if[:, H:2 * H]
        c_new = i * g if c is None else f * c + i * g   # c is None => c was zero
        return o * jnp.tanh(c_new), c_new

    # ---- peeled t = 0 (all states start at zero: both h@W_hh matmuls vanish) ---
    h0, c0 = gate_act(xproj_ref[0:B, :], None)
    gates1 = jnp.dot(h0, w256_ref[_OFF_WIH1:_OFF_WIH1 + 64, :],
                     preferred_element_type=f32) + b1_b
    h1, c1 = gate_act(gates1, None)

    # ---- t = 1 .. 4: 2-layer recurrence, weights sliced from VMEM at use site --
    # TODO(synk): on v7x, keep W_hh0 / W_ih1 / W_hh1 resident in MXU staging regs
    # via pltpu.matmul_push_rhs / matmul_acc_lhs and accumulate in the MRB; kept
    # on jnp.dot here for portability across v5e/v6e/v7x.
    for t in range(1, TIME_STEPS):
        # The h1_{t-1} half of layer 1 does not depend on h0_t -> overlaps layer 0.
        g1_prev = jnp.dot(h1, w256_ref[_OFF_WHH1:_OFF_WHH1 + 64, :],
                          preferred_element_type=f32)
        gates0 = xproj_ref[t * B:(t + 1) * B, :] + jnp.dot(
            h0, w256_ref[_OFF_WHH0:_OFF_WHH0 + 64, :], preferred_element_type=f32)
        h0, c0 = gate_act(gates0, c0)
        gates1 = jnp.dot(h0, w256_ref[_OFF_WIH1:_OFF_WIH1 + 64, :],
                         preferred_element_type=f32) + g1_prev + b1_b
        h1, c1 = gate_act(gates1, c1)

    # ---- head: fc1/fc2 on the MXU, fc3/fc4 on the VPU/XLU (dropout = identity) -
    y = jnp.dot(h1, w256_ref[_OFF_WF1:_OFF_WF1 + 64, :], preferred_element_type=f32)
    y = jnp.maximum(y + tail_ref[_ROW_BF1:_ROW_BF1 + 1, :], 0.0)          # (B, 256)
    y = jnp.dot(y, wf2_ref[...], preferred_element_type=f32)
    y = jnp.maximum(y + tail_ref[_ROW_BF2:_ROW_BF2 + 1, 0:64], 0.0)       # (B, 64)

    # fc3 (64 -> 8): broadcast-multiply + lane reduce, no MXU push/drain.
    wf3t = tail_ref[_ROW_WF3T:_ROW_WF3T + 8, 0:64]                        # (8, 64)
    y_b = jax.lax.broadcast_in_dim(y, (B, 8, 64), (0, 2))
    w_b = jax.lax.broadcast_in_dim(wf3t, (B, 8, 64), (1, 2))
    y3 = jnp.sum(y_b * w_b, axis=-1)                                      # (B, 8)
    y3 = jnp.maximum(y3 + tail_ref[_ROW_BF3:_ROW_BF3 + 1, 0:8], 0.0)

    # fc4 (8 -> 1): elementwise multiply + lane reduce.
    y4 = jnp.sum(y3 * tail_ref[_ROW_WF4:_ROW_WF4 + 1, 0:8], axis=-1, keepdims=True)
    y4 = y4 + tail_ref[_ROW_BF4:_ROW_BF4 + 1, 0:1]                        # (B, 1)

    # Lane-dense output: broadcast the scalar across 128 lanes -> unmasked vst.
    out_ref[...] = jnp.broadcast_to(y4, (B, 128)).astype(out_ref.dtype)


def pack_params(params):
    """Repack PyTorch-layout params into 4 lane/sublane-aligned slabs."""
    (w_pre, b_pre, wih0, whh0, b0, wih1, whh1, b1,
     wf1, bf1, wf2, bf2, wf3, bf3, wf4, bf4) = params

    def reorder_gates(w):
        # PyTorch gate order [i, f, g, o] -> [i, f, o, g].
        return jnp.concatenate(
            [w[..., 0:2 * H], w[..., 3 * H:4 * H], w[..., 2 * H:3 * H]], axis=-1)

    # Gate-weight slab (320, 256): wih0 | whh0 | wih1 | whh1 | wf1.
    w256 = jnp.concatenate(
        [reorder_gates(wih0), reorder_gates(whh0),
         reorder_gates(wih1), reorder_gates(whh1), wf1], axis=0).astype(jnp.float32)

    # Block-diagonal pre_fc weight (128, 64): row block t = w_pre[:, 64t:64(t+1)],
    # row 100+t = b_pre block t (selected by the indicator column in x_bd).
    w_pre_bd = jnp.zeros((KBD, INPUT_DIM), jnp.float32)
    for t in range(TIME_STEPS):
        w_pre_bd = w_pre_bd.at[t * K_IN:(t + 1) * K_IN, :].set(
            w_pre[:, t * INPUT_DIM:(t + 1) * INPUT_DIM])
        w_pre_bd = w_pre_bd.at[TIME_STEPS * K_IN + t, :].set(
            b_pre[0, t * INPUT_DIM:(t + 1) * INPUT_DIM])

    # Tail slab (16, 256): all biases + fc3^T + fc4 row.
    tail = jnp.zeros((16, G), jnp.float32)
    tail = tail.at[_ROW_B0, :].set(reorder_gates(b0)[0])
    tail = tail.at[_ROW_B1, :].set(reorder_gates(b1)[0])
    tail = tail.at[_ROW_BF1, :].set(bf1[0])
    tail = tail.at[_ROW_BF2, 0:64].set(bf2[0])
    tail = tail.at[_ROW_BF3, 0:8].set(bf3[0])
    tail = tail.at[_ROW_BF4, 0:1].set(bf4[0])
    tail = tail.at[_ROW_WF4, 0:8].set(wf4[:, 0])
    tail = tail.at[_ROW_WF3T:_ROW_WF3T + 8, 0:64].set(wf3.T)

    return (w256, w_pre_bd, wf2.astype(jnp.float32), tail)


def clf_lstm_forward(x, packed_params):
    """x: (B, TIME_STEPS, X_DIM) float32.  packed_params from pack_params()."""
    w256, w_pre_bd, wf2, tail = packed_params
    B = x.shape[0]
    Bp = max(8, ((B + 7) // 8) * 8)          # pad batch to an f32 sublane multiple

    x_flat = x.reshape(B, K_IN).astype(jnp.float32)
    if Bp != B:
        x_flat = jnp.pad(x_flat, ((0, Bp - B), (0, 0)))

    # Block-diagonal, time-major pre_fc input (layout plumbing, no extra compute):
    # row block t carries x_flat in columns [20t:20(t+1)] and 1.0 in column 100+t
    # (bias selector), so the kernel needs a single matmul and no relayout.
    blocks = []
    for t in range(TIME_STEPS):
        blk = jnp.zeros((Bp, KBD), jnp.float32)
        blk = blk.at[:, t * K_IN:(t + 1) * K_IN].set(x_flat)
        blk = blk.at[:, TIME_STEPS * K_IN + t].set(1.0)
        blocks.append(blk)
    x_bd = jnp.concatenate(blocks, axis=0)   # (TIME_STEPS * Bp, 128)

    vmem = pl.BlockSpec(memory_space=pltpu.MemorySpace.VMEM)
    out = pl.pallas_call(
        clf_lstm_kernel,
        out_shape=jax.ShapeDtypeStruct((Bp, 128), jnp.float32),
        in_specs=[vmem] * 5,
        out_specs=vmem,
        scratch_shapes=[pltpu.VMEM((TIME_STEPS * Bp, G), jnp.float32)],
    )(x_bd, w256, w_pre_bd, wf2, tail)
    return out[:B, 0:1]


def init_params(key):
    """Deterministic parameter init (PyTorch-style U(-1/sqrt(fan_in), +...))."""
    def uniform(k, shape, fan_in):
        bound = 1.0 / (fan_in ** 0.5)
        return jax.random.uniform(k, shape, jnp.float32, -bound, bound)

    keys = jax.random.split(key, 24)
    ki = iter(keys)

    # pre_fc: Linear(20 -> 320); stored as (in, out)
    w_pre = uniform(next(ki), (K_IN, TIME_STEPS * INPUT_DIM), K_IN)
    b_pre = uniform(next(ki), (1, TIME_STEPS * INPUT_DIM), K_IN)

    # LSTM layer 0 / 1: stored transposed (in, 4H); gate order i,f,g,o.
    def lstm_layer(in_dim):
        w_ih = uniform(next(ki), (in_dim, 4 * HIDDEN_DIM), HIDDEN_DIM)
        w_hh = uniform(next(ki), (HIDDEN_DIM, 4 * HIDDEN_DIM), HIDDEN_DIM)
        b_ih = uniform(next(ki), (1, 4 * HIDDEN_DIM), HIDDEN_DIM)
        b_hh = uniform(next(ki), (1, 4 * HIDDEN_DIM), HIDDEN_DIM)
        return w_ih, w_hh, b_ih + b_hh          # combined bias

    wih0, whh0, b0 = lstm_layer(INPUT_DIM)
    wih1, whh1, b1 = lstm_layer(HIDDEN_DIM)

    # fc1: 64->256, fc2: 256->64, fc3: 64->8, fc4: 8->1 (stored as (in, out))
    wf1 = uniform(next(ki), (HIDDEN_DIM, 256), HIDDEN_DIM)
    bf1 = uniform(next(ki), (1, 256), HIDDEN_DIM)
    wf2 = uniform(next(ki), (256, 64), 256)
    bf2 = uniform(next(ki), (1, 64), 256)
    wf3 = uniform(next(ki), (64, 8), 64)
    bf3 = uniform(next(ki), (1, 8), 64)
    wf4 = uniform(next(ki), (8, 1), 8)
    bf4 = uniform(next(ki), (1, 1), 8)

    return (w_pre, b_pre, wih0, whh0, b0, wih1, whh1, b1,
            wf1, bf1, wf2, bf2, wf3, bf3, wf4, bf4)


def reference_forward(x, params):
    """Pure-JAX reference mirroring the PyTorch forward (eval mode)."""
    (w_pre, b_pre, wih0, whh0, b0, wih1, whh1, b1,
     wf1, bf1, wf2, bf2, wf3, bf3, wf4, bf4) = params
    B = x.shape[0]
    out = x.reshape(B, -1)
    out = jax.nn.relu(out @ w_pre + b_pre)
    out = out.reshape(B, TIME_STEPS, INPUT_DIM)

    def cell(x_t, h, c, wih, whh, b):
        g = x_t @ wih + h @ whh + b
        i = jax.nn.sigmoid(g[:, :H])
        f = jax.nn.sigmoid(g[:, H:2 * H])
        gg = jnp.tanh(g[:, 2 * H:3 * H])
        o = jax.nn.sigmoid(g[:, 3 * H:])
        c = f * c + i * gg
        return o * jnp.tanh(c), c

    h0 = c0 = h1 = c1 = jnp.zeros((B, H), jnp.float32)
    for t in range(TIME_STEPS):
        h0, c0 = cell(out[:, t, :], h0, c0, wih0, whh0, b0)
        h1, c1 = cell(h0, h1, c1, wih1, whh1, b1)
    y = h1
    y = jax.nn.relu(y @ wf1 + bf1)
    y = jax.nn.relu(y @ wf2 + bf2)
    y = jax.nn.relu(y @ wf3 + bf3)
    return y @ wf4 + bf4


if __name__ == "__main__":
    key = jax.random.PRNGKey(0)
    k_x, k_p = jax.random.split(key)
    x = jax.random.uniform(k_x, (BATCH, TIME_STEPS, X_DIM), jnp.float32)
    params = init_params(k_p)
    packed = pack_params(params)

    out = clf_lstm_forward(x, packed)
    out = jax.block_until_ready(out)

    ref = reference_forward(x, params)
    assert out.shape == (BATCH, 1), out.shape
    assert jnp.allclose(out, ref, rtol=2e-4, atol=2e-4), (out, ref)
    # TODO(synk): training-mode dropout (p=0.5) would need pltpu.prng_* masks;
    # eval-mode identity is implemented here, matching the reference semantics.
    print("KERNEL_OK")
</pallas_src>

<mosaic_0001>
module attributes {stable_mosaic.version = 11 : i64} {
  func.func @clf_lstm_kernel(%arg0: memref<40x128xf32, #tpu.memory_space<vmem>>, %arg1: memref<320x256xf32, #tpu.memory_space<vmem>>, %arg2: memref<128x64xf32, #tpu.memory_space<vmem>>, %arg3: memref<256x64xf32, #tpu.memory_space<vmem>>, %arg4: memref<16x256xf32, #tpu.memory_space<vmem>>, %arg5: memref<8x128xf32, #tpu.memory_space<vmem>>, %arg6: memref<40x256xf32, #tpu.memory_space<vmem>>) attributes {dimension_semantics = [], scalar_prefetch = 0 : i64, scratch_operands = 1 : i64, tpu.core_type = #tpu.core_type<tc>} {
    %c0 = arith.constant 0 : index
    %c0_0 = arith.constant 0 : index
    %0 = vector.load %arg0[%c0, %c0_0] : memref<40x128xf32, #tpu.memory_space<vmem>>, vector<40x128xf32>
    %c0_1 = arith.constant 0 : index
    %c0_2 = arith.constant 0 : index
    %1 = vector.load %arg2[%c0_1, %c0_2] : memref<128x64xf32, #tpu.memory_space<vmem>>, vector<128x64xf32>
    %cst = arith.constant dense<0.000000e+00> : vector<40x64xf32>
    %2 = tpu.matmul %0, %1, %cst {dimension_numbers = #tpu.dot_dimension_numbers<[1], [0], [0], [1], [0, 0, 1, 1], [], []>} : vector<40x128xf32>, vector<128x64xf32>, vector<40x64xf32> -> vector<40x64xf32>
    %cst_3 = arith.constant 0.000000e+00 : f32
    %3 = vector.broadcast %cst_3 : f32 to vector<40x64xf32>
    %4 = arith.maximumf %2, %3 : vector<40x64xf32>
    %c0_4 = arith.constant 0 : index
    %c0_5 = arith.constant 0 : index
    %5 = vector.load %arg4[%c0_4, %c0_5] : memref<16x256xf32, #tpu.memory_space<vmem>>, vector<1x256xf32>
    %6 = vector.shape_cast %5 : vector<1x256xf32> to vector<1x256xf32>
    %7 = vector.broadcast %6 : vector<1x256xf32> to vector<40x256xf32>
    %c0_6 = arith.constant 0 : index
    %c0_7 = arith.constant 0 : index
    %8 = vector.load %arg1[%c0_6, %c0_7] : memref<320x256xf32, #tpu.memory_space<vmem>>, vector<64x256xf32>
    %cst_8 = arith.constant dense<0.000000e+00> : vector<40x256xf32>
    %9 = tpu.matmul %4, %8, %cst_8 {dimension_numbers = #tpu.dot_dimension_numbers<[1], [0], [0], [1], [0, 0, 1, 1], [], []>} : vector<40x64xf32>, vector<64x256xf32>, vector<40x256xf32> -> vector<40x256xf32>
    %10 = arith.addf %9, %7 : vector<40x256xf32>
    %c0_9 = arith.constant 0 : index
    %c0_10 = arith.constant 0 : index
    %11 = vector.load %arg6[%c0_9, %c0_10] : memref<40x256xf32, #tpu.memory_space<vmem>>, vector<40x256xf32>
    tpu.vector_store %arg6[%c0_9, %c0_10], %10 {strides = array<i32>} : memref<40x256xf32, #tpu.memory_space<vmem>>, vector<40x256xf32>,
    %c1 = arith.constant 1 : index
    %c0_11 = arith.constant 0 : index
    %12 = vector.load %arg4[%c1, %c0_11] : memref<16x256xf32, #tpu.memory_space<vmem>>, vector<1x256xf32>
    %13 = vector.shape_cast %12 : vector<1x256xf32> to vector<1x256xf32>
    %14 = vector.broadcast %13 : vector<1x256xf32> to vector<8x256xf32>
    %c0_12 = arith.constant 0 : index
    %c0_13 = arith.constant 0 : index
    %15 = vector.load %arg6[%c0_12, %c0_13] : memref<40x256xf32, #tpu.memory_space<vmem>>, vector<8x256xf32>
    %16 = vector.extract_strided_slice %15 {offsets = [0, 0], sizes = [8, 128], strides = [1, 1]} : vector<8x256xf32> to vector<8x128xf32>
    %17 = arith.negf %16 : vector<8x128xf32>
    %18 = math.exp %17 : vector<8x128xf32>
    %cst_14 = arith.constant 1.000000e+00 : f32
    %19 = vector.broadcast %cst_14 : f32 to vector<8x128xf32>
    %20 = arith.addf %19, %18 : vector<8x128xf32>
    %21 = arith.divf %19, %20 : vector<8x128xf32>
    %22 = vector.extract_strided_slice %15 {offsets = [0, 128], sizes = [8, 64], strides = [1, 1]} : vector<8x256xf32> to vector<8x64xf32>
    %23 = arith.negf %22 : vector<8x64xf32>
    %24 = math.exp %23 : vector<8x64xf32>
    %cst_15 = arith.constant 1.000000e+00 : f32
    %25 = vector.broadcast %cst_15 : f32 to vector<8x64xf32>
    %26 = arith.addf %25, %24 : vector<8x64xf32>
    %27 = arith.divf %25, %26 : vector<8x64xf32>
    %28 = vector.extract_strided_slice %15 {offsets = [0, 192], sizes = [8, 64], strides = [1, 1]} : vector<8x256xf32> to vector<8x64xf32>
    %29 = math.tanh %28 : vector<8x64xf32>
    %30 = vector.extract_strided_slice %21 {offsets = [0, 0], sizes = [8, 64], strides = [1, 1]} : vector<8x128xf32> to vector<8x64xf32>
    %31 = arith.mulf %30, %29 : vector<8x64xf32>
    %32 = math.tanh %31 : vector<8x64xf32>
    %33 = arith.mulf %27, %32 : vector<8x64xf32>
    %c128 = arith.constant 128 : index
    %c0_16 = arith.constant 0 : index
    %34 = vector.load %arg1[%c128, %c0_16] : memref<320x256xf32, #tpu.memory_space<vmem>>, vector<64x256xf32>
    %cst_17 = arith.constant dense<0.000000e+00> : vector<8x256xf32>
    %35 = tpu.matmul %33, %34, %cst_17 {dimension_numbers = #tpu.dot_dimension_numbers<[1], [0], [0], [1], [0, 0, 1, 1], [], []>} : vector<8x64xf32>, vector<64x256xf32>, vector<8x256xf32> -> vector<8x256xf32>
    %36 = arith.addf %35, %14 : vector<8x256xf32>
    %37 = vector.extract_strided_slice %36 {offsets = [0, 0], sizes = [8, 128], strides = [1, 1]} : vector<8x256xf32> to vector<8x128xf32>
    %38 = arith.negf %37 : vector<8x128xf32>
    %39 = math.exp %38 : vector<8x128xf32>
    %cst_18 = arith.constant 1.000000e+00 : f32
    %40 = vector.broadcast %cst_18 : f32 to vector<8x128xf32>
    %41 = arith.addf %40, %39 : vector<8x128xf32>
    %42 = arith.divf %40, %41 : vector<8x128xf32>
    %43 = vector.extract_strided_slice %36 {offsets = [0, 128], sizes = [8, 64], strides = [1, 1]} : vector<8x256xf32> to vector<8x64xf32>
    %44 = arith.negf %43 : vector<8x64xf32>
    %45 = math.exp %44 : vector<8x64xf32>
    %cst_19 = arith.constant 1.000000e+00 : f32
    %46 = vector.broadcast %cst_19 : f32 to vector<8x64xf32>
    %47 = arith.addf %46, %45 : vector<8x64xf32>
    %48 = arith.divf %46, %47 : vector<8x64xf32>
    %49 = vector.extract_strided_slice %36 {offsets = [0, 192], sizes = [8, 64], strides = [1, 1]} : vector<8x256xf32> to vector<8x64xf32>
    %50 = math.tanh %49 : vector<8x64xf32>
    %51 = vector.extract_strided_slice %42 {offsets = [0, 0], sizes = [8, 64], strides = [1, 1]} : vector<8x128xf32> to vector<8x64xf32>
    %52 = arith.mulf %51, %50 : vector<8x64xf32>
    %53 = math.tanh %52 : vector<8x64xf32>
    %54 = arith.mulf %48, %53 : vector<8x64xf32>
    %c192 = arith.constant 192 : index
    %c0_20 = arith.constant 0 : index
    %55 = vector.load %arg1[%c192, %c0_20] : memref<320x256xf32, #tpu.memory_space<vmem>>, vector<64x256xf32>
    %cst_21 = arith.constant dense<0.000000e+00> : vector<8x256xf32>
    %56 = tpu.matmul %54, %55, %cst_21 {dimension_numbers = #tpu.dot_dimension_numbers<[1], [0], [0], [1], [0, 0, 1, 1], [], []>} : vector<8x64xf32>, vector<64x256xf32>, vector<8x256xf32> -> vector<8x256xf32>
    %c8 = arith.constant 8 : index
    %c0_22 = arith.constant 0 : index
    %57 = vector.load %arg6[%c8, %c0_22] : memref<40x256xf32, #tpu.memory_space<vmem>>, vector<8x256xf32>
    %c64 = arith.constant 64 : index
    %c0_23 = arith.constant 0 : index
    %58 = vector.load %arg1[%c64, %c0_23] : memref<320x256xf32, #tpu.memory_space<vmem>>, vector<64x256xf32>
    %cst_24 = arith.constant dense<0.000000e+00> : vector<8x256xf32>
    %59 = tpu.matmul %33, %58, %cst_24 {dimension_numbers = #tpu.dot_dimension_numbers<[1], [0], [0], [1], [0, 0, 1, 1], [], []>} : vector<8x64xf32>, vector<64x256xf32>, vector<8x256xf32> -> vector<8x256xf32>
    %60 = arith.addf %57, %59 : vector<8x256xf32>
    %61 = vector.extract_strided_slice %60 {offsets = [0, 0], sizes = [8, 128], strides = [1, 1]} : vector<8x256xf32> to vector<8x128xf32>
    %62 = arith.negf %61 : vector<8x128xf32>
    %63 = math.exp %62 : vector<8x128xf32>
    %cst_25 = arith.constant 1.000000e+00 : f32
    %64 = vector.broadcast %cst_25 : f32 to vector<8x128xf32>
    %65 = arith.addf %64, %63 : vector<8x128xf32>
    %66 = arith.divf %64, %65 : vector<8x128xf32>
    %67 = vector.extract_strided_slice %60 {offsets = [0, 128], sizes = [8, 64], strides = [1, 1]} : vector<8x256xf32> to vector<8x64xf32>
    %68 = arith.negf %67 : vector<8x64xf32>
    %69 = math.exp %68 : vector<8x64xf32>
    %cst_26 = arith.constant 1.000000e+00 : f32
    %70 = vector.broadcast %cst_26 : f32 to vector<8x64xf32>
    %71 = arith.addf %70, %69 : vector<8x64xf32>
    %72 = arith.divf %70, %71 : vector<8x64xf32>
    %73 = vector.extract_strided_slice %60 {offsets = [0, 192], sizes = [8, 64], strides = [1, 1]} : vector<8x256xf32> to vector<8x64xf32>
    %74 = math.tanh %73 : vector<8x64xf32>
    %75 = vector.extract_strided_slice %66 {offsets = [0, 0], sizes = [8, 64], strides = [1, 1]} : vector<8x128xf32> to vector<8x64xf32>
    %76 = vector.extract_strided_slice %66 {offsets = [0, 64], sizes = [8, 64], strides = [1, 1]} : vector<8x128xf32> to vector<8x64xf32>
    %77 = arith.mulf %76, %31 : vector<8x64xf32>
    %78 = arith.mulf %75, %74 : vector<8x64xf32>
    %79 = arith.addf %77, %78 : vector<8x64xf32>
    %80 = math.tanh %79 : vector<8x64xf32>
    %81 = arith.mulf %72, %80 : vector<8x64xf32>
    %c128_27 = arith.constant 128 : index
    %c0_28 = arith.constant 0 : index
    %82 = vector.load %arg1[%c128_27, %c0_28] : memref<320x256xf32, #tpu.memory_space<vmem>>, vector<64x256xf32>
    %cst_29 = arith.constant dense<0.000000e+00> : vector<8x256xf32>
    %83 = tpu.matmul %81, %82, %cst_29 {dimension_numbers = #tpu.dot_dimension_numbers<[1], [0], [0], [1], [0, 0, 1, 1], [], []>} : vector<8x64xf32>, vector<64x256xf32>, vector<8x256xf32> -> vector<8x256xf32>
    %84 = arith.addf %83, %56 : vector<8x256xf32>
    %85 = arith.addf %84, %14 : vector<8x256xf32>
    %86 = vector.extract_strided_slice %85 {offsets = [0, 0], sizes = [8, 128], strides = [1, 1]} : vector<8x256xf32> to vector<8x128xf32>
    %87 = arith.negf %86 : vector<8x128xf32>
    %88 = math.exp %87 : vector<8x128xf32>
    %cst_30 = arith.constant 1.000000e+00 : f32
    %89 = vector.broadcast %cst_30 : f32 to vector<8x128xf32>
    %90 = arith.addf %89, %88 : vector<8x128xf32>
    %91 = arith.divf %89, %90 : vector<8x128xf32>
    %92 = vector.extract_strided_slice %85 {offsets = [0, 128], sizes = [8, 64], strides = [1, 1]} : vector<8x256xf32> to vector<8x64xf32>
    %93 = arith.negf %92 : vector<8x64xf32>
    %94 = math.exp %93 : vector<8x64xf32>
    %cst_31 = arith.constant 1.000000e+00 : f32
    %95 = vector.broadcast %cst_31 : f32 to vector<8x64xf32>
    %96 = arith.addf %95, %94 : vector<8x64xf32>
    %97 = arith.divf %95, %96 : vector<8x64xf32>
    %98 = vector.extract_strided_slice %85 {offsets = [0, 192], sizes = [8, 64], strides = [1, 1]} : vector<8x256xf32> to vector<8x64xf32>
    %99 = math.tanh %98 : vector<8x64xf32>
    %100 = vector.extract_strided_slice %91 {offsets = [0, 0], sizes = [8, 64], strides = [1, 1]} : vector<8x128xf32> to vector<8x64xf32>
    %101 = vector.extract_strided_slice %91 {offsets = [0, 64], sizes = [8, 64], strides = [1, 1]} : vector<8x128xf32> to vector<8x64xf32>
    %102 = arith.mulf %101, %52 : vector<8x64xf32>
    %103 = arith.mulf %100, %99 : vector<8x64xf32>
    %104 = arith.addf %102, %103 : vector<8x64xf32>
    %105 = math.tanh %104 : vector<8x64xf32>
    %106 = arith.mulf %97, %105 : vector<8x64xf32>
    %c192_32 = arith.constant 192 : index
    %c0_33 = arith.constant 0 : index
    %107 = vector.load %arg1[%c192_32, %c0_33] : memref<320x256xf32, #tpu.memory_space<vmem>>, vector<64x256xf32>
    %cst_34 = arith.constant dense<0.000000e+00> : vector<8x256xf32>
    %108 = tpu.matmul %106, %107, %cst_34 {dimension_numbers = #tpu.dot_dimension_numbers<[1], [0], [0], [1], [0, 0, 1, 1], [], []>} : vector<8x64xf32>, vector<64x256xf32>, vector<8x256xf32> -> vector<8x256xf32>
    %c16 = arith.constant 16 : index
    %c0_35 = arith.constant 0 : index
    %109 = vector.load %arg6[%c16, %c0_35] : memref<40x256xf32, #tpu.memory_space<vmem>>, vector<8x256xf32>
    %c64_36 = arith.constant 64 : index
    %c0_37 = arith.constant 0 : index
    %110 = vector.load %arg1[%c64_36, %c0_37] : memref<320x256xf32, #tpu.memory_space<vmem>>, vector<64x256xf32>
    %cst_38 = arith.constant dense<0.000000e+00> : vector<8x256xf32>
    %111 = tpu.matmul %81, %110, %cst_38 {dimension_numbers = #tpu.dot_dimension_numbers<[1], [0], [0], [1], [0, 0, 1, 1], [], []>} : vector<8x64xf32>, vector<64x256xf32>, vector<8x256xf32> -> vector<8x256xf32>
    %112 = arith.addf %109, %111 : vector<8x256xf32>
    %113 = vector.extract_strided_slice %112 {offsets = [0, 0], sizes = [8, 128], strides = [1, 1]} : vector<8x256xf32> to vector<8x128xf32>
    %114 = arith.negf %113 : vector<8x128xf32>
    %115 = math.exp %114 : vector<8x128xf32>
    %cst_39 = arith.constant 1.000000e+00 : f32
    %116 = vector.broadcast %cst_39 : f32 to vector<8x128xf32>
    %117 = arith.addf %116, %115 : vector<8x128xf32>
    %118 = arith.divf %116, %117 : vector<8x128xf32>
    %119 = vector.extract_strided_slice %112 {offsets = [0, 128], sizes = [8, 64], strides = [1, 1]} : vector<8x256xf32> to vector<8x64xf32>
    %120 = arith.negf %119 : vector<8x64xf32>
    %121 = math.exp %120 : vector<8x64xf32>
    %cst_40 = arith.constant 1.000000e+00 : f32
    %122 = vector.broadcast %cst_40 : f32 to vector<8x64xf32>
    %123 = arith.addf %122, %121 : vector<8x64xf32>
    %124 = arith.divf %122, %123 : vector<8x64xf32>
    %125 = vector.extract_strided_slice %112 {offsets = [0, 192], sizes = [8, 64], strides = [1, 1]} : vector<8x256xf32> to vector<8x64xf32>
    %126 = math.tanh %125 : vector<8x64xf32>
    %127 = vector.extract_strided_slice %118 {offsets = [0, 0], sizes = [8, 64], strides = [1, 1]} : vector<8x128xf32> to vector<8x64xf32>
    %128 = vector.extract_strided_slice %118 {offsets = [0, 64], sizes = [8, 64], strides = [1, 1]} : vector<8x128xf32> to vector<8x64xf32>
    %129 = arith.mulf %128, %79 : vector<8x64xf32>
    %130 = arith.mulf %127, %126 : vector<8x64xf32>
    %131 = arith.addf %129, %130 : vector<8x64xf32>
    %132 = math.tanh %131 : vector<8x64xf32>
    %133 = arith.mulf %124, %132 : vector<8x64xf32>
    %c128_41 = arith.constant 128 : index
    %c0_42 = arith.constant 0 : index
    %134 = vector.load %arg1[%c128_41, %c0_42] : memref<320x256xf32, #tpu.memory_space<vmem>>, vector<64x256xf32>
    %cst_43 = arith.constant dense<0.000000e+00> : vector<8x256xf32>
    %135 = tpu.matmul %133, %134, %cst_43 {dimension_numbers = #tpu.dot_dimension_numbers<[1], [0], [0], [1], [0, 0, 1, 1], [], []>} : vector<8x64xf32>, vector<64x256xf32>, vector<8x256xf32> -> vector<8x256xf32>
    %136 = arith.addf %135, %108 : vector<8x256xf32>
    %137 = arith.addf %136, %14 : vector<8x256xf32>
    %138 = vector.extract_strided_slice %137 {offsets = [0, 0], sizes = [8, 128], strides = [1, 1]} : vector<8x256xf32> to vector<8x128xf32>
    %139 = arith.negf %138 : vector<8x128xf32>
    %140 = math.exp %139 : vector<8x128xf32>
    %cst_44 = arith.constant 1.000000e+00 : f32
    %141 = vector.broadcast %cst_44 : f32 to vector<8x128xf32>
    %142 = arith.addf %141, %140 : vector<8x128xf32>
    %143 = arith.divf %141, %142 : vector<8x128xf32>
    %144 = vector.extract_strided_slice %137 {offsets = [0, 128], sizes = [8, 64], strides = [1, 1]} : vector<8x256xf32> to vector<8x64xf32>
    %145 = arith.negf %144 : vector<8x64xf32>
    %146 = math.exp %145 : vector<8x64xf32>
    %cst_45 = arith.constant 1.000000e+00 : f32
    %147 = vector.broadcast %cst_45 : f32 to vector<8x64xf32>
    %148 = arith.addf %147, %146 : vector<8x64xf32>
    %149 = arith.divf %147, %148 : vector<8x64xf32>
    %150 = vector.extract_strided_slice %137 {offsets = [0, 192], sizes = [8, 64], strides = [1, 1]} : vector<8x256xf32> to vector<8x64xf32>
    %151 = math.tanh %150 : vector<8x64xf32>
    %152 = vector.extract_strided_slice %143 {offsets = [0, 0], sizes = [8, 64], strides = [1, 1]} : vector<8x128xf32> to vector<8x64xf32>
    %153 = vector.extract_strided_slice %143 {offsets = [0, 64], sizes = [8, 64], strides = [1, 1]} : vector<8x128xf32> to vector<8x64xf32>
    %154 = arith.mulf %153, %104 : vector<8x64xf32>
    %155 = arith.mulf %152, %151 : vector<8x64xf32>
    %156 = arith.addf %154, %155 : vector<8x64xf32>
    %157 = math.tanh %156 : vector<8x64xf32>
    %158 = arith.mulf %149, %157 : vector<8x64xf32>
    %c192_46 = arith.constant 192 : index
    %c0_47 = arith.constant 0 : index
    %159 = vector.load %arg1[%c192_46, %c0_47] : memref<320x256xf32, #tpu.memory_space<vmem>>, vector<64x256xf32>
    %cst_48 = arith.constant dense<0.000000e+00> : vector<8x256xf32>
    %160 = tpu.matmul %158, %159, %cst_48 {dimension_numbers = #tpu.dot_dimension_numbers<[1], [0], [0], [1], [0, 0, 1, 1], [], []>} : vector<8x64xf32>, vector<64x256xf32>, vector<8x256xf32> -> vector<8x256xf32>
    %c24 = arith.constant 24 : index
    %c0_49 = arith.constant 0 : index
    %161 = vector.load %arg6[%c24, %c0_49] : memref<40x256xf32, #tpu.memory_space<vmem>>, vector<8x256xf32>
    %c64_50 = arith.constant 64 : index
    %c0_51 = arith.constant 0 : index
    %162 = vector.load %arg1[%c64_50, %c0_51] : memref<320x256xf32, #tpu.memory_space<vmem>>, vector<64x256xf32>
    %cst_52 = arith.constant dense<0.000000e+00> : vector<8x256xf32>
    %163 = tpu.matmul %133, %162, %cst_52 {dimension_numbers = #tpu.dot_dimension_numbers<[1], [0], [0], [1], [0, 0, 1, 1], [], []>} : vector<8x64xf32>, vector<64x256xf32>, vector<8x256xf32> -> vector<8x256xf32>
    %164 = arith.addf %161, %163 : vector<8x256xf32>
    %165 = vector.extract_strided_slice %164 {offsets = [0, 0], sizes = [8, 128], strides = [1, 1]} : vector<8x256xf32> to vector<8x128xf32>
    %166 = arith.negf %165 : vector<8x128xf32>
    %167 = math.exp %166 : vector<8x128xf32>
    %cst_53 = arith.constant 1.000000e+00 : f32
    %168 = vector.broadcast %cst_53 : f32 to vector<8x128xf32>
    %169 = arith.addf %168, %167 : vector<8x128xf32>
    %170 = arith.divf %168, %169 : vector<8x128xf32>
    %171 = vector.extract_strided_slice %164 {offsets = [0, 128], sizes = [8, 64], strides = [1, 1]} : vector<8x256xf32> to vector<8x64xf32>
    %172 = arith.negf %171 : vector<8x64xf32>
    %173 = math.exp %172 : vector<8x64xf32>
    %cst_54 = arith.constant 1.000000e+00 : f32
    %174 = vector.broadcast %cst_54 : f32 to vector<8x64xf32>
    %175 = arith.addf %174, %173 : vector<8x64xf32>
    %176 = arith.divf %174, %175 : vector<8x64xf32>
    %177 = vector.extract_strided_slice %164 {offsets = [0, 192], sizes = [8, 64], strides = [1, 1]} : vector<8x256xf32> to vector<8x64xf32>
    %178 = math.tanh %177 : vector<8x64xf32>
    %179 = vector.extract_strided_slice %170 {offsets = [0, 0], sizes = [8, 64], strides = [1, 1]} : vector<8x128xf32> to vector<8x64xf32>
    %180 = vector.extract_strided_slice %170 {offsets = [0, 64], sizes = [8, 64], strides = [1, 1]} : vector<8x128xf32> to vector<8x64xf32>
    %181 = arith.mulf %180, %131 : vector<8x64xf32>
    %182 = arith.mulf %179, %178 : vector<8x64xf32>
    %183 = arith.addf %181, %182 : vector<8x64xf32>
    %184 = math.tanh %183 : vector<8x64xf32>
    %185 = arith.mulf %176, %184 : vector<8x64xf32>
    %c128_55 = arith.constant 128 : index
    %c0_56 = arith.constant 0 : index
    %186 = vector.load %arg1[%c128_55, %c0_56] : memref<320x256xf32, #tpu.memory_space<vmem>>, vector<64x256xf32>
    %cst_57 = arith.constant dense<0.000000e+00> : vector<8x256xf32>
    %187 = tpu.matmul %185, %186, %cst_57 {dimension_numbers = #tpu.dot_dimension_numbers<[1], [0], [0], [1], [0, 0, 1, 1], [], []>} : vector<8x64xf32>, vector<64x256xf32>, vector<8x256xf32> -> vector<8x256xf32>
    %188 = arith.addf %187, %160 : vector<8x256xf32>
    %189 = arith.addf %188, %14 : vector<8x256xf32>
    %190 = vector.extract_strided_slice %189 {offsets = [0, 0], sizes = [8, 128], strides = [1, 1]} : vector<8x256xf32> to vector<8x128xf32>
    %191 = arith.negf %190 : vector<8x128xf32>
    %192 = math.exp %191 : vector<8x128xf32>
    %cst_58 = arith.constant 1.000000e+00 : f32
    %193 = vector.broadcast %cst_58 : f32 to vector<8x128xf32>
    %194 = arith.addf %193, %192 : vector<8x128xf32>
    %195 = arith.divf %193, %194 : vector<8x128xf32>
    %196 = vector.extract_strided_slice %189 {offsets = [0, 128], sizes = [8, 64], strides = [1, 1]} : vector<8x256xf32> to vector<8x64xf32>
    %197 = arith.negf %196 : vector<8x64xf32>
    %198 = math.exp %197 : vector<8x64xf32>
    %cst_59 = arith.constant 1.000000e+00 : f32
    %199 = vector.broadcast %cst_59 : f32 to vector<8x64xf32>
    %200 = arith.addf %199, %198 : vector<8x64xf32>
    %201 = arith.divf %199, %200 : vector<8x64xf32>
    %202 = vector.extract_strided_slice %189 {offsets = [0, 192], sizes = [8, 64], strides = [1, 1]} : vector<8x256xf32> to vector<8x64xf32>
    %203 = math.tanh %202 : vector<8x64xf32>
    %204 = vector.extract_strided_slice %195 {offsets = [0, 0], sizes = [8, 64], strides = [1, 1]} : vector<8x128xf32> to vector<8x64xf32>
    %205 = vector.extract_strided_slice %195 {offsets = [0, 64], sizes = [8, 64], strides = [1, 1]} : vector<8x128xf32> to vector<8x64xf32>
    %206 = arith.mulf %205, %156 : vector<8x64xf32>
    %207 = arith.mulf %204, %203 : vector<8x64xf32>
    %208 = arith.addf %206, %207 : vector<8x64xf32>
    %209 = math.tanh %208 : vector<8x64xf32>
    %210 = arith.mulf %201, %209 : vector<8x64xf32>
    %c192_60 = arith.constant 192 : index
    %c0_61 = arith.constant 0 : index
    %211 = vector.load %arg1[%c192_60, %c0_61] : memref<320x256xf32, #tpu.memory_space<vmem>>, vector<64x256xf32>
    %cst_62 = arith.constant dense<0.000000e+00> : vector<8x256xf32>
    %212 = tpu.matmul %210, %211, %cst_62 {dimension_numbers = #tpu.dot_dimension_numbers<[1], [0], [0], [1], [0, 0, 1, 1], [], []>} : vector<8x64xf32>, vector<64x256xf32>, vector<8x256xf32> -> vector<8x256xf32>
    %c32 = arith.constant 32 : index
    %c0_63 = arith.constant 0 : index
    %213 = vector.load %arg6[%c32, %c0_63] : memref<40x256xf32, #tpu.memory_space<vmem>>, vector<8x256xf32>
    %c64_64 = arith.constant 64 : index
    %c0_65 = arith.constant 0 : index
    %214 = vector.load %arg1[%c64_64, %c0_65] : memref<320x256xf32, #tpu.memory_space<vmem>>, vector<64x256xf32>
    %cst_66 = arith.constant dense<0.000000e+00> : vector<8x256xf32>
    %215 = tpu.matmul %185, %214, %cst_66 {dimension_numbers = #tpu.dot_dimension_numbers<[1], [0], [0], [1], [0, 0, 1, 1], [], []>} : vector<8x64xf32>, vector<64x256xf32>, vector<8x256xf32> -> vector<8x256xf32>
    %216 = arith.addf %213, %215 : vector<8x256xf32>
    %217 = vector.extract_strided_slice %216 {offsets = [0, 0], sizes = [8, 128], strides = [1, 1]} : vector<8x256xf32> to vector<8x128xf32>
    %218 = arith.negf %217 : vector<8x128xf32>
    %219 = math.exp %218 : vector<8x128xf32>
    %cst_67 = arith.constant 1.000000e+00 : f32
    %220 = vector.broadcast %cst_67 : f32 to vector<8x128xf32>
    %221 = arith.addf %220, %219 : vector<8x128xf32>
    %222 = arith.divf %220, %221 : vector<8x128xf32>
    %223 = vector.extract_strided_slice %216 {offsets = [0, 128], sizes = [8, 64], strides = [1, 1]} : vector<8x256xf32> to vector<8x64xf32>
    %224 = arith.negf %223 : vector<8x64xf32>
    %225 = math.exp %224 : vector<8x64xf32>
    %cst_68 = arith.constant 1.000000e+00 : f32
    %226 = vector.broadcast %cst_68 : f32 to vector<8x64xf32>
    %227 = arith.addf %226, %225 : vector<8x64xf32>
    %228 = arith.divf %226, %227 : vector<8x64xf32>
    %229 = vector.extract_strided_slice %216 {offsets = [0, 192], sizes = [8, 64], strides = [1, 1]} : vector<8x256xf32> to vector<8x64xf32>
    %230 = math.tanh %229 : vector<8x64xf32>
    %231 = vector.extract_strided_slice %222 {offsets = [0, 0], sizes = [8, 64], strides = [1, 1]} : vector<8x128xf32> to vector<8x64xf32>
    %232 = vector.extract_strided_slice %222 {offsets = [0, 64], sizes = [8, 64], strides = [1, 1]} : vector<8x128xf32> to vector<8x64xf32>
    %233 = arith.mulf %232, %183 : vector<8x64xf32>
    %234 = arith.mulf %231, %230 : vector<8x64xf32>
    %235 = arith.addf %233, %234 : vector<8x64xf32>
    %236 = math.tanh %235 : vector<8x64xf32>
    %237 = arith.mulf %228, %236 : vector<8x64xf32>
    %c128_69 = arith.constant 128 : index
    %c0_70 = arith.constant 0 : index
    %238 = vector.load %arg1[%c128_69, %c0_70] : memref<320x256xf32, #tpu.memory_space<vmem>>, vector<64x256xf32>
    %cst_71 = arith.constant dense<0.000000e+00> : vector<8x256xf32>
    %239 = tpu.matmul %237, %238, %cst_71 {dimension_numbers = #tpu.dot_dimension_numbers<[1], [0], [0], [1], [0, 0, 1, 1], [], []>} : vector<8x64xf32>, vector<64x256xf32>, vector<8x256xf32> -> vector<8x256xf32>
    %240 = arith.addf %239, %212 : vector<8x256xf32>
    %241 = arith.addf %240, %14 : vector<8x256xf32>
    %242 = vector.extract_strided_slice %241 {offsets = [0, 0], sizes = [8, 128], strides = [1, 1]} : vector<8x256xf32> to vector<8x128xf32>
    %243 = arith.negf %242 : vector<8x128xf32>
    %244 = math.exp %243 : vector<8x128xf32>
    %cst_72 = arith.constant 1.000000e+00 : f32
    %245 = vector.broadcast %cst_72 : f32 to vector<8x128xf32>
    %246 = arith.addf %245, %244 : vector<8x128xf32>
    %247 = arith.divf %245, %246 : vector<8x128xf32>
    %248 = vector.extract_strided_slice %241 {offsets = [0, 128], sizes = [8, 64], strides = [1, 1]} : vector<8x256xf32> to vector<8x64xf32>
    %249 = arith.negf %248 : vector<8x64xf32>
    %250 = math.exp %249 : vector<8x64xf32>
    %cst_73 = arith.constant 1.000000e+00 : f32
    %251 = vector.broadcast %cst_73 : f32 to vector<8x64xf32>
    %252 = arith.addf %251, %250 : vector<8x64xf32>
    %253 = arith.divf %251, %252 : vector<8x64xf32>
    %254 = vector.extract_strided_slice %241 {offsets = [0, 192], sizes = [8, 64], strides = [1, 1]} : vector<8x256xf32> to vector<8x64xf32>
    %255 = math.tanh %254 : vector<8x64xf32>
    %256 = vector.extract_strided_slice %247 {offsets = [0, 0], sizes = [8, 64], strides = [1, 1]} : vector<8x128xf32> to vector<8x64xf32>
    %257 = vector.extract_strided_slice %247 {offsets = [0, 64], sizes = [8, 64], strides = [1, 1]} : vector<8x128xf32> to vector<8x64xf32>
    %258 = arith.mulf %257, %208 : vector<8x64xf32>
    %259 = arith.mulf %256, %255 : vector<8x64xf32>
    %260 = arith.addf %258, %259 : vector<8x64xf32>
    %261 = math.tanh %260 : vector<8x64xf32>
    %262 = arith.mulf %253, %261 : vector<8x64xf32>
    %c256 = arith.constant 256 : index
    %c0_74 = arith.constant 0 : index
    %263 = vector.load %arg1[%c256, %c0_74] : memref<320x256xf32, #tpu.memory_space<vmem>>, vector<64x256xf32>
    %cst_75 = arith.constant dense<0.000000e+00> : vector<8x256xf32>
    %264 = tpu.matmul %262, %263, %cst_75 {dimension_numbers = #tpu.dot_dimension_numbers<[1], [0], [0], [1], [0, 0, 1, 1], [], []>} : vector<8x64xf32>, vector<64x256xf32>, vector<8x256xf32> -> vector<8x256xf32>
    %c2 = arith.constant 2 : index
    %c0_76 = arith.constant 0 : index
    %265 = vector.load %arg4[%c2, %c0_76] : memref<16x256xf32, #tpu.memory_space<vmem>>, vector<1x256xf32>
    %266 = vector.broadcast %265 : vector<1x256xf32> to vector<8x256xf32>
    %267 = arith.addf %264, %266 : vector<8x256xf32>
    %cst_77 = arith.constant 0.000000e+00 : f32
    %268 = vector.broadcast %cst_77 : f32 to vector<8x256xf32>
    %269 = arith.maximumf %267, %268 : vector<8x256xf32>
    %c0_78 = arith.constant 0 : index
    %c0_79 = arith.constant 0 : index
    %270 = vector.load %arg3[%c0_78, %c0_79] : memref<256x64xf32, #tpu.memory_space<vmem>>, vector<256x64xf32>
    %cst_80 = arith.constant dense<0.000000e+00> : vector<8x64xf32>
    %271 = tpu.matmul %269, %270, %cst_80 {dimension_numbers = #tpu.dot_dimension_numbers<[1], [0], [0], [1], [0, 0, 1, 1], [], []>} : vector<8x256xf32>, vector<256x64xf32>, vector<8x64xf32> -> vector<8x64xf32>
    %c3 = arith.constant 3 : index
    %c0_81 = arith.constant 0 : index
    %272 = vector.load %arg4[%c3, %c0_81] : memref<16x256xf32, #tpu.memory_space<vmem>>, vector<1x64xf32>
    %273 = vector.broadcast %272 : vector<1x64xf32> to vector<8x64xf32>
    %274 = arith.addf %271, %273 : vector<8x64xf32>
    %cst_82 = arith.constant 0.000000e+00 : f32
    %275 = vector.broadcast %cst_82 : f32 to vector<8x64xf32>
    %276 = arith.maximumf %274, %275 : vector<8x64xf32>
    %c8_83 = arith.constant 8 : index
    %c0_84 = arith.constant 0 : index
    %277 = vector.load %arg4[%c8_83, %c0_84] : memref<16x256xf32, #tpu.memory_space<vmem>>, vector<8x64xf32>
    %278 = vector.shape_cast %276 : vector<8x64xf32> to vector<8x1x64xf32>
    %279 = vector.broadcast %278 : vector<8x1x64xf32> to vector<8x8x64xf32>
    %280 = vector.shape_cast %277 : vector<8x64xf32> to vector<1x8x64xf32>
    %281 = vector.broadcast %280 : vector<1x8x64xf32> to vector<8x8x64xf32>
    %282 = arith.mulf %279, %281 : vector<8x8x64xf32>
    %cst_85 = arith.constant dense<0.000000e+00> : vector<8x8xf32>
    %283 = vector.multi_reduction <add>, %282, %cst_85 [2] : vector<8x8x64xf32> to vector<8x8xf32>
    %c4 = arith.constant 4 : index
    %c0_86 = arith.constant 0 : index
    %284 = vector.load %arg4[%c4, %c0_86] : memref<16x256xf32, #tpu.memory_space<vmem>>, vector<1x8xf32>
    %285 = vector.broadcast %284 : vector<1x8xf32> to vector<8x8xf32>
    %286 = arith.addf %283, %285 : vector<8x8xf32>
    %cst_87 = arith.constant 0.000000e+00 : f32
    %287 = vector.broadcast %cst_87 : f32 to vector<8x8xf32>
    %288 = arith.maximumf %286, %287 : vector<8x8xf32>
    %c6 = arith.constant 6 : index
    %c0_88 = arith.constant 0 : index
    %289 = vector.load %arg4[%c6, %c0_88] : memref<16x256xf32, #tpu.memory_space<vmem>>, vector<1x8xf32>
    %290 = vector.broadcast %289 : vector<1x8xf32> to vector<8x8xf32>
    %291 = arith.mulf %288, %290 : vector<8x8xf32>
    %cst_89 = arith.constant dense<0.000000e+00> : vector<8xf32>
    %292 = vector.multi_reduction <add>, %291, %cst_89 [1] : vector<8x8xf32> to vector<8xf32>
    %293 = vector.shape_cast %292 : vector<8xf32> to vector<8x1xf32>
    %c5 = arith.constant 5 : index
    %c0_90 = arith.constant 0 : index
    %294 = vector.load %arg4[%c5, %c0_90] : memref<16x256xf32, #tpu.memory_space<vmem>>, vector<1x1xf32>
    %295 = vector.broadcast %294 : vector<1x1xf32> to vector<8x1xf32>
    %296 = arith.addf %293, %295 : vector<8x1xf32>
    %297 = vector.shape_cast %296 : vector<8x1xf32> to vector<8x1xf32>
    %298 = vector.broadcast %297 : vector<8x1xf32> to vector<8x128xf32>
    %c0_91 = arith.constant 0 : index
    %c0_92 = arith.constant 0 : index
    %299 = vector.load %arg5[%c0_91, %c0_92] : memref<8x128xf32, #tpu.memory_space<vmem>>, vector<8x128xf32>
    tpu.vector_store %arg5[%c0_91, %c0_92], %298 {strides = array<i32>} : memref<8x128xf32, #tpu.memory_space<vmem>>, vector<8x128xf32>,
    return
  }
}

</mosaic_0001>

<bundles_post_ra>
// kernel: tpu_custom_call.1
= control target key start
LH: loop header
LB: loop body
LE: loop exit
PB: predicated region body
PF: predicated region fallthrough
CT: control target
= control target key end

     0   :  { %10 = vsyncpa [#allocation4], 0  ;;  %s3322_s0 = inlined_call_operand.vmem [shape: f32[40,128], index: 0, kind: input, shape index: {}]   ;;  %s3323_s1 = inlined_call_operand.hbm [shape: f32[320,256], index: 1, kind: input, shape index: {}]   ;;  %s3324_s2 = inlined_call_operand.vmem [shape: f32[128,64], index: 2, kind: input, shape index: {}]   ;;  %s3325_s3 = inlined_call_operand.vmem [shape: f32[256,64], index: 3, kind: input, shape index: {}]   ;;  %s3326_s4 = inlined_call_operand.vmem [shape: f32[16,256], index: 4, kind: input, shape index: {}]   ;;  %s3327_s5 = inlined_call_operand.hbm [shape: f32[8,128], index: 5, kind: output, shape index: {}]  }
   0x1   :  { %11 = vsyncpa [#allocation5], 0  ;;  %s2745_s18 = smov [#allocation3]   ;;  %s2697_s22 = scalar_lea.hbm %s3323_s1, 10240 }
   0x2   :  { %s19_s19 = sshll.u32 %s2745_s18, 4  ;;  %p2698_p0 = scmp.ne.s32.totalorder %s3323_s1, %s2697_s22  ;;  %s20_s19 = int_to_ptr.vmem [resolvable:$true] %s19_s19 }
   0x3   :  { %p2701_p1 = scmp.lt.u32.totalorder %s2697_s22, %s3323_s1 }
   0x5   :  { %p2703_p2 = pnand %p2701_p1, %p2698_p0 }
   0x7   :  { %2706 = shalt.err (!%p2703_p2)
}
   0x8   :  { %s2707_s27 = scalar_lea.vmem %s20_s19, 10240  ;;  %p2712_p4 = scmp.lt.s32.totalorder %s20_s19, %s20_s19 }
   0x9   :  { %p2708_p3 = scmp.ne.s32.totalorder %s20_s19, %s2707_s27  ;;  %p2713_p5 = scmp.lt.s32.totalorder %s2707_s27, %s2707_s27 }
   0xb   :  { %p2714_p6 = por %p2713_p5, %p2712_p4 }
   0xd   :  { %p2715_p7 = pnand %p2714_p6, %p2708_p3 }
   0xf   :  { %2718 = shalt.err (!%p2715_p7)
}
  0x10   :  { %s2746_s28 = smov 256   ;;  %s2747_s29 = smov 16  }
  0x11   :  { %25 = dma.hbm_to_vmem [thread:$0]  %s3323_s1, 10240, %s20_s19, [#allocation4], %s2746_s28, %s2746_s28, %s2747_s29  }
  0x12   :  { %2741 = dma.done.wait [#allocation4], 10240  }
  0x13   :  { %2742 = vsyncadd [#allocation4], 4294957056  ;;  %v2748_v0 = vmov 0.0|0.0   ;;  %vm2749_vm0 = vmmov 0   ;;  %v2750_v1 = vmov 0.0   ;;  %v40_v2 = vld [vmem:[%s3324_s2] sm:$0xff] }
  0x14   :  { %2245 = vmatprep.subr.bf16.mxu0 %v2748_v0  ;;  %2230 = vmatprep.mubr.msk.f32.mxu0 %vm2749_vm0, %v2750_v1  ;;  %v41_v3 = vld [vmem:[%s3324_s2 + $0x8] sm:$0xff]  ;;  %v42_v4 = vld [vmem:[%s3324_s2 + $0x10] sm:$0xff]  ;;  %v43_v6 = vld [vmem:[%s3324_s2 + $0x18] sm:$0xff]  ;;  %vm179_vm1 = vcmask 523264   ;;  %s2751_s22 = smov 64   ;;  %vm2059_vm2 = vcmask 1041409  }
  0x15   :  { %259 = vmatprep.mubr.f32.mxu1 %v2750_v1  ;;  %v2246_v5 = vpack.c.bf16 %v41_v3, %v40_v2  ;;  %v2249_v7 = vpack.c.bf16 %v43_v6, %v42_v4  ;;  %v44_v8 = vld [vmem:[%s3324_s2 + $0x20] sm:$0xff]  ;;  %v45_v9 = vld [vmem:[%s3324_s2 + $0x28] sm:$0xff]  ;;  %v46_v11 = vld [vmem:[%s3324_s2 + $0x30] sm:$0xff]  ;;  %vm2061_vm3 = vcmask 1042434   ;;  %vm2063_vm4 = vcmask 1043459   ;;  %s2754_s17 = smov [#allocation6]  }
  0x16   :  { %v164_v10 = vld [vmem:[#allocation3 + $0x8] sm:$0xff]  ;;  %v47_v12 = vld [vmem:[%s3324_s2 + $0x38] sm:$0xff]  ;;  %v163_v14 = vld [vmem:[#allocation3] sm:$0xff]  ;;  %v2252_v16 = vpack.c.bf16 %v45_v9, %v44_v8  ;;  %vm2065_vm5 = vcmask 1044484   ;;  %vm2067_vm6 = vcmask 1045509   ;;  %vm2069_vm7 = vcmask 1046534  }
  0x17   :  { %2247 = vmatpush3.bf16.msra.mxu0 %v2246_v5  ;;  %v166_v13 = vld [vmem:[#allocation3 + $0x18] sm:$0xff]  ;;  %v165_v15 = vld [vmem:[#allocation3 + $0x10] sm:$0xff]  ;;  %v168_v19 = vld [vmem:[#allocation3 + $0x28] sm:$0xff]  ;;  %v2255_v27 = vpack.c.bf16 %v47_v12, %v46_v11  ;;  %vm2071_vm8 = vcmask 1047559   ;;  %vm2074_vm9 = vcmask 64512   ;;  %s2092_s18 = sshll.u32 %s2754_s17, 4  ;;  %s2093_s18 = int_to_ptr.vmem [resolvable:$true] %s2092_s18 }
  0x18   :  { %2248 = vmatprep.subr.bf16.mxu0 %v2748_v0  ;;  %v2269_v17 = vpack.c.bf16 %v166_v13, %v164_v10  ;;  %v2271_v18 = vpack.c.bf16 %v165_v15, %v163_v14  ;;  %v170_v20 = vld [vmem:[#allocation3 + $0x38] sm:$0xff]  ;;  %v167_v21 = vld [vmem:[#allocation3 + $0x20] sm:$0xff]  ;;  %v169_v23 = vld [vmem:[#allocation3 + $0x30] sm:$0xff]  ;;  %s2719_s19 = scalar_lea.vmem %s2093_s18, 128  ;;  %p2724_p9 = scmp.lt.s32.totalorder %s2093_s18, %s2093_s18 }
  0x19   :  { %v2273_v22 = vpack.c.bf16 %v170_v20, %v168_v19  ;;  %v172_v24 = vld [vmem:[#allocation3 + $0x48] sm:$0xff]  ;;  %v174_v25 = vld [vmem:[#allocation3 + $0x58] sm:$0xff]  ;;  %v2275_v26 = vpack.c.bf16 %v169_v23, %v167_v21  ;;  %v48_v28 = vld [vmem:[%s3324_s2 + $0x40] sm:$0xff]  ;;  %p2720_p8 = scmp.ne.s32.totalorder %s2093_s18, %s2719_s19  ;;  %p2725_p10 = scmp.lt.s32.totalorder %s2719_s19, %s2719_s19 }
  0x1a   :  { %2270 = vmatprep.subr.bf16.mxu1 %v2269_v17  ;;  %v2277_v29 = vpack.c.bf16 %v174_v25, %v172_v24  ;;  %v171_v30 = vld [vmem:[#allocation3 + $0x40] sm:$0xff]  ;;  %v173_v31 = vld [vmem:[#allocation3 + $0x50] sm:$0xff]  ;;  %v49_v32 = vld [vmem:[%s3324_s2 + $0x48] sm:$0xff] }
  0x1b   :  { %2250 = vmatpush3.bf16.msra.mxu0 %v2249_v7  ;;  %2272 = vmatpush1.bf16.msra.mxu1 %v2271_v18  ;;  %v176_v33 = vld [vmem:[#allocation3 + $0x68] sm:$0xff]  ;;  %v178_v34 = vld [vmem:[#allocation3 + $0x78] sm:$0xff]  ;;  %v2279_v35 = vpack.c.bf16 %v173_v31, %v171_v30  ;;  %v2258_v36 = vpack.c.bf16 %v49_v32, %v48_v28  ;;  %v50_v38 = vld [vmem:[%s3324_s2 + $0x50] sm:$0xff]  ;;  %v153_v7 = vlaneseq  ;;  %p2726_p11 = por %p2725_p10, %p2724_p9 }
  0x1c   :  { %2251 = vmatprep.subr.bf16.mxu0 %v2748_v0  ;;  %2274 = vmatprep.subr.bf16.mxu1 %v2273_v22  ;;  %v2281_v37 = vpack.c.bf16 %v178_v34, %v176_v33  ;;  %v51_v39 = vld [vmem:[%s3324_s2 + $0x58] sm:$0xff]  ;;  %v52_v41 = vld [vmem:[%s3324_s2 + $0x60] sm:$0xff]  ;;  %v53_v42 = vld [vmem:[%s3324_s2 + $0x68] sm:$0xff] }
  0x1d   :  { %v2261_v40 = vpack.c.bf16 %v51_v39, %v50_v38  ;;  %v2264_v43 = vpack.c.bf16 %v53_v42, %v52_v41  ;;  %v54_v44 = vld [vmem:[%s3324_s2 + $0x70] sm:$0xff]  ;;  %v55_v45 = vld [vmem:[%s3324_s2 + $0x78] sm:$0xff]  ;;  %v35_v47 = vld [vmem:[%s3322_s0] sm:$0xff]  ;;  %v2894_v8 = vshrl.u32 %v153_v7, 7  ;;  %p2727_p12 = pnand %p2726_p11, %p2720_p8 }
  0x1e   :  { %v2267_v46 = vpack.c.bf16 %v55_v45, %v54_v44  ;;  %v175_v48 = vld [vmem:[#allocation3 + $0x60] sm:$0xff]  ;;  %v177_v49 = vld [vmem:[#allocation3 + $0x70] sm:$0xff]  ;;  %v36_v51 = vld [vmem:[%s3322_s0 + $0x8] sm:$0xff] }
  0x1f   :  { %2253 = vmatpush3.bf16.msra.mxu0 %v2252_v16  ;;  %2276 = vmatpush1.bf16.msra.mxu1 %v2275_v26  ;;  %v2283_v50 = vpack.c.bf16 %v177_v49, %v175_v48  ;;  %v37_v52 = vld [vmem:[%s3322_s0 + $0x10] sm:$0xff]  ;;  %v38_v53 = vld [vmem:[%s3322_s0 + $0x18] sm:$0xff]  ;;  %v39_v54 = vld [vmem:[%s3322_s0 + $0x20] sm:$0xff]  ;;  %v2897_v9 = vsub.s32 1, %v2894_v8 }
  0x20   :  { %2254 = vmatprep.subr.bf16.mxu0 %v2748_v0  ;;  %2278 = vmatprep.subr.bf16.mxu1 %v2277_v29  ;;  %v336_v58 = vld [vmem:[#allocation3 + $0x108] sm:$0xff]  ;;  %v338_v59 = vld [vmem:[#allocation3 + $0x118] sm:$0xff]  ;;  %v335_v61 = vld [vmem:[#allocation3 + $0x100] sm:$0xff] }
  0x21   :  { %v2882_v62 = vpack.c.bf16 %v338_v59, %v336_v58  ;;  %v340_v3 = vld [vmem:[#allocation3 + $0x128] sm:$0xff]  ;;  %v342_v4 = vld [vmem:[#allocation3 + $0x138] sm:$0xff]  ;;  %v339_v17 = vld [vmem:[#allocation3 + $0x120] sm:$0xff] }
  0x22   :  { %v2886_v6 = vpack.c.bf16 %v342_v4, %v340_v3  ;;  %v151_v10 = vld [vmem:[%s3326_s4] ss:$8 sm:$0x3]  ;;  %v341_v18 = vld [vmem:[#allocation3 + $0x130] sm:$0xff]  ;;  %v346_v23 = vld [vmem:[#allocation3 + $0x158] sm:$0xff] }
  0x23   :  { %2256 = vmatpush3.bf16.msra.mxu0 %v2255_v27  ;;  %2280 = vmatpush1.bf16.msra.mxu1 %v2279_v35  ;;  %v2903_v11 = vrot.slane %v151_v10, %v2897_v9  ;;  %v2906_v20 = vpack.c.bf16 %v341_v18, %v339_v17  ;;  %v344_v22 = vld [vmem:[#allocation3 + $0x148] sm:$0xff]  ;;  %v343_v26 = vld [vmem:[#allocation3 + $0x140] sm:$0xff]  ;;  %v345_v27 = vld [vmem:[#allocation3 + $0x150] sm:$0xff] }
  0x24   :  { %2257 = vmatprep.subr.bf16.mxu0 %v2748_v0  ;;  %2282 = vmatprep.subr.bf16.mxu1 %v2281_v37  ;;  %v2910_v25 = vpack.c.bf16 %v346_v23, %v344_v22  ;;  %v2912_v29 = vpack.c.bf16 %v345_v27, %v343_v26  ;;  %v348_v31 = vld [vmem:[#allocation3 + $0x168] sm:$0xff]  ;;  %v350_v32 = vld [vmem:[#allocation3 + $0x178] sm:$0xff]  ;;  %v347_v35 = vld [vmem:[#allocation3 + $0x160] sm:$0xff] }
  0x25   :  { %v2918_v34 = vpack.c.bf16 %v350_v32, %v348_v31  ;;  %v538_v39 = vld [vmem:[#allocation3 + $0x88] sm:$0xff]  ;;  %v544_v58 = vld [vmem:[#allocation3 + $0xb8] sm:$0xff]  ;;  %v543_v3 = vld [vmem:[#allocation3 + $0xb0] sm:$0xff] }
  0x26   :  { %v546_v4 = vld [vmem:[#allocation3 + $0xc8] sm:$0xff]  ;;  %v552_v17 = vld [vmem:[#allocation3 + $0xf8] sm:$0xff]  ;;  %v551_v22 = vld [vmem:[#allocation3 + $0xf0] sm:$0xff] }
  0x27   :  { %2259 = vmatpush3.bf16.msra.mxu0 %v2258_v36  ;;  %2284 = vmatpush1.bf16.msra.mxu1 %v2283_v50  ;;  %v349_v36 = vld [vmem:[#allocation3 + $0x170] sm:$0xff]  ;;  %v2106_v27 = vld [vmem:[%s3326_s4 + $0x1] ss:$8 sm:$0x3] }
  0x28   :  { %2260 = vmatprep.subr.bf16.mxu0 %v2748_v0  ;;  %2286 = vmatprep.subr.bf16.mxu1 %v2882_v62  ;;  %v2921_v38 = vpack.c.bf16 %v349_v36, %v347_v35  ;;  %v448_v35 = vld [vmem:[#allocation3 + $0x198] sm:$0xff] }
  0x2b   :  { %2262 = vmatpush3.bf16.msra.mxu0 %v2261_v40  ;;  %v540_v40 = vld [vmem:[#allocation3 + $0x98] sm:$0xff] }
  0x2c   :  { %2263 = vmatprep.subr.bf16.mxu0 %v2748_v0  ;;  %v2926_v42 = vpack.c.bf16 %v540_v40, %v538_v39  ;;  %v447_v39 = vld [vmem:[#allocation3 + $0x190] sm:$0xff] }
  0x2f   :  { %2265 = vmatpush3.bf16.msra.mxu0 %v2264_v43  ;;  %v2932_v43 = vsub.s32 0, %v2894_v8 }
  0x30   :  { %2266 = vmatprep.subr.bf16.mxu0 %v2748_v0  ;;  %v337_v0 = vld [vmem:[#allocation3 + $0x110] sm:$0xff] }
  0x31   :  { %v2884_v5 = vpack.c.bf16 %v337_v0, %v335_v61  ;;  %v2935_v44 = vrot.slane %v151_v10, %v2932_v43  ;;  %v548_v10 = vld [vmem:[#allocation3 + $0xd8] sm:$0xff] }
  0x33   :  { %2268 = vmatpush3.bf16.msra.mxu0 %v2267_v46 }
  0x36   :  { %2231 = vmatmul.mubr.f32.vlgmr.msra.gmra.mrb[0].mxu0 %v35_v47 }
  0x37   :  { %2233 = vmatprep.mubr.msk.f32.mxu0 %vm2749_vm0, %v2750_v1 }
  0x3a   :  { %2234 = vmatmul.mubr.f32.gmra.mrb[2].mxu0 %v36_v51 }
  0x3b   :  { %2236 = vmatprep.mubr.msk.f32.mxu0 %vm2749_vm0, %v2750_v1 }
  0x3e   :  { %2237 = vmatmul.mubr.f32.gmra.mrb[4].mxu0 %v37_v52 }
  0x3f   :  { %2239 = vmatprep.mubr.msk.f32.mxu0 %vm2749_vm0, %v2750_v1 }
  0x42   :  { %2240 = vmatmul.mubr.f32.gmra.mrb[6].mxu0 %v38_v53 }
  0x43   :  { %2242 = vmatprep.mubr.msk.f32.mxu0 %vm2749_vm0, %v2750_v1 }
  0x46   :  { %2243 = vmatmul.mubr.f32.gmra.mrb[8].mxu0 %v39_v54 }
  0x47   :  { %528 = vmatprep.mubr.f32.mxu0 %v2750_v1 }
 0x109   :  { %v122_v55 = vpop.f32.mrb[0].mxu0 }
 0x10a   :  { %v146_v56 = vmax.f32 %v122_v55, 0.0  ;;  %v2232_v57 = vpop.f32.mrb[1].mxu0  ;;  %v537_v55 = vld [vmem:[#allocation3 + $0x80] sm:$0xff] }
 0x10b   :  { %v542_v57 = vld [vmem:[#allocation3 + $0xa8] sm:$0xff] }
 0x10c   :  { %2101 = vmatmul.mubr.msk.f32.vlgmr.msra.gmra.mrb[0].mxu1 %vm179_vm1, %v146_v56  ;;  %v539_v56 = vld [vmem:[#allocation3 + $0x90] sm:$0xff]  ;;  %v2941_v0 = vpack.c.bf16 %v544_v58, %v542_v57  ;;  %v458_v58 = vld [vmem:[#allocation3 + $0x1e8] sm:$0xff] }
 0x10d   :  { %265 = vmatprep.mubr.f32.mxu1 %v2750_v1  ;;  %v127_v60 = vpop.f32.mrb[2].mxu0  ;;  %2288 = vmatpush1.bf16.msra.mxu1 %v2884_v5  ;;  %v2939_v61 = vpack.c.bf16 %v539_v56, %v537_v55  ;;  %v455_v55 = vld [vmem:[#allocation3 + $0x1d0] sm:$0xff] }
 0x10e   :  { %v147_v63 = vmax.f32 %v127_v60, 0.0  ;;  %v2235_v2 = vpop.f32.mrb[3].mxu0  ;;  %2290 = vmatprep.subr.bf16.mxu1 %v2886_v6 }
 0x10f   :  { %v541_v2 = vld [vmem:[#allocation3 + $0xa0] sm:$0xff] }
 0x110   :  { %2102 = vmatmul.mubr.msk.f32.gmra.mrb[2].mxu1 %vm179_vm1, %v147_v63 }
 0x111   :  { %271 = vmatprep.mubr.f32.mxu1 %v2750_v1  ;;  %v132_v14 = vpop.f32.mrb[4].mxu0  ;;  %2292 = vmatpush1.bf16.msra.mxu1 %v2906_v20 }
 0x112   :  { %v2238_v16 = vpop.f32.mrb[5].mxu0  ;;  %v148_v19 = vmax.f32 %v132_v14, 0.0  ;;  %2294 = vmatprep.subr.bf16.mxu1 %v2910_v25  ;;  %v545_v14 = vld [vmem:[#allocation3 + $0xc0] sm:$0xff] }
 0x113   :  { %v550_v16 = vld [vmem:[#allocation3 + $0xe8] sm:$0xff] }
 0x114   :  { %2103 = vmatmul.mubr.msk.f32.gmra.mrb[4].mxu1 %vm179_vm1, %v148_v19  ;;  %v2955_v19 = vpack.c.bf16 %v552_v17, %v550_v16 }
 0x115   :  { %v137_v21 = vpop.f32.mrb[6].mxu0  ;;  %277 = vmatprep.mubr.f32.mxu1 %v2750_v1  ;;  %2296 = vmatpush1.bf16.msra.mxu1 %v2912_v29 }
 0x116   :  { %v2241_v24 = vpop.f32.mrb[7].mxu0  ;;  %v149_v28 = vmax.f32 %v137_v21, 0.0  ;;  %2298 = vmatprep.subr.bf16.mxu1 %v2918_v34  ;;  %v549_v21 = vld [vmem:[#allocation3 + $0xe0] sm:$0xff] }
 0x117   :  { %v2958_v23 = vpack.c.bf16 %v551_v22, %v549_v21 }
 0x118   :  { %2104 = vmatmul.mubr.msk.f32.gmra.mrb[6].mxu1 %vm179_vm1, %v149_v28  ;;  %v2968_v28 = vrot.slane %v2106_v27, %v2897_v9 }
 0x119   :  { %v142_v30 = vpop.f32.mrb[8].mxu0  ;;  %283 = vmatprep.mubr.f32.mxu1 %v2750_v1  ;;  %2300 = vmatpush1.bf16.msra.mxu1 %v2921_v38 }
 0x11a   :  { %v2244_v33 = vpop.f32.mrb[9].mxu0  ;;  %v150_v37 = vmax.f32 %v142_v30, 0.0  ;;  %2318 = vmatprep.subr.bf16.mxu1 %v2926_v42 }
 0x11b   :  { %v446_v33 = vld [vmem:[#allocation3 + $0x188] sm:$0xff] }
 0x11c   :  { %2105 = vmatmul.mubr.msk.f32.gmra.mrb[8].mxu1 %vm179_vm1, %v150_v37  ;;  %v2973_v36 = vpack.c.bf16 %v448_v35, %v446_v33  ;;  %v445_v37 = vld [vmem:[#allocation3 + $0x180] sm:$0xff] }
 0x11d   :  { %418 = vmatprep.mubr.f32.mxu1 %v2750_v1 }
 0x11e   :  { %2302 = vmatprep.subr.bf16.mxu0 %v2973_v36 }
 0x1df   :  { %v261_v12 = vpop.f32.mrb[0].mxu1 }
 0x1e0   :  { %v263_v13 = vpop.f32.mrb[1].mxu1  ;;  %v262_v45 = vadd.f32 %v261_v12, %v2935_v44  ;;  %v2945_v12 = vpack.c.bf16 %v543_v3, %v541_v2  ;;  %v459_v2 = vld [vmem:[#allocation3 + $0x1f0] sm:$0xff] }
 0x1e1   :  { %v264_v15 = vadd.f32 %v263_v13, %v2903_v11  ;;  %v2949_v13 = vpack.c.bf16 %v548_v10, %v546_v4  ;;  %v3012_v10 = vrot.slane %v2106_v27, %v2932_v43 }
 0x1e2   :  { %v2107_v46 = vmul.f32 -1.442695, %v262_v45  ;;  %v450_v45 = vld [vmem:[#allocation3 + $0x1a8] sm:$0xff] }
 0x1e3   :  { %2577 = vtanh.f32 %v264_v15  ;;  %v2108_v47 = vmul.f32 -1.442695, %v264_v15  ;;  %v547_v15 = vld [vmem:[#allocation3 + $0xd0] sm:$0xff] }
 0x1e4   :  { %2579 = vpow2.f32 %v2107_v46  ;;  %v2952_v18 = vpack.c.bf16 %v547_v15, %v545_v14  ;;  %v452_v46 = vld [vmem:[#allocation3 + $0x1b8] sm:$0xff] }
 0x1e5   :  { %2581 = vpow2.f32 %v2108_v47  ;;  %v2983_v47 = vpack.c.bf16 %v452_v46, %v450_v45 }
 0x1ed   :  { %v2578_v41 = vpop.eup %2577 }
 0x1ee   :  { %329 = vrot.lane.b32.xlu0 %v2578_v41, %s2751_s22  ;;  %v2580_v48 = vpop.eup %2579  ;;  %v2977_v41 = vpack.c.bf16 %v447_v39, %v445_v37 }
 0x1ef   :  { %v318_v49 = vadd.f32 1.0, %v2580_v48  ;;  %v2582_v50 = vpop.eup %2581  ;;  %v449_v48 = vld [vmem:[#allocation3 + $0x1a0] sm:$0xff] }
 0x1f0   :  { %v324_v51 = vadd.f32 1.0, %v2582_v50  ;;  %2304 = vmatpush1.bf16.msra.mxu0 %v2977_v41 }
 0x1f1   :  { %2583 = vrcp.f32 %v318_v49  ;;  %v451_v49 = vld [vmem:[#allocation3 + $0x1b0] sm:$0xff]  ;;  %2306 = vmatprep.subr.bf16.mxu0 %v2983_v47 }
 0x1f2   :  { %2585 = vrcp.f32 %v324_v51  ;;  %v2985_v50 = vpack.c.bf16 %v451_v49, %v449_v48  ;;  %v454_v51 = vld [vmem:[#allocation3 + $0x1c8] sm:$0xff] }
 0x1f4   :  { %2308 = vmatpush1.bf16.msra.mxu0 %v2985_v50 }
 0x1fb   :  { %v2584_v52 = vpop.eup %2583 }
 0x1fc   :  { %v2586_v59 = vpop.eup %2585 }
 0x260   :  { %v330_v53 = vpop.permute.xlu0 %329 }
 0x261   :  { %v332_v54 = vmul.f32 %v2584_v52, %v330_v53  ;;  %v456_v52 = vld [vmem:[#allocation3 + $0x1d8] sm:$0xff] }
 0x262   :  { %v2991_v53 = vpack.c.bf16 %v456_v52, %v454_v51 }
 0x263   :  { %2587 = vtanh.f32 %v332_v54  ;;  %640 = vrot.lane.b32.xlu1 %v332_v54, %s2751_s22  ;;  %v453_v54 = vld [vmem:[#allocation3 + $0x1c0] sm:$0xff] }
 0x264   :  { %v2993_v56 = vpack.c.bf16 %v455_v55, %v453_v54  ;;  %2310 = vmatprep.subr.bf16.mxu0 %v2991_v53 }
 0x266   :  { %2312 = vmatpush1.bf16.msra.mxu0 %v2993_v56 }
 0x26d   :  { %v2588_v60 = vpop.eup %2587 }
 0x26e   :  { %v334_v63 = vmul.f32 %v2588_v60, %v2586_v59  ;;  %v460_v59 = vld [vmem:[#allocation3 + $0x1f8] sm:$0xff] }
 0x26f   :  { %v3000_v60 = vpack.c.bf16 %v460_v59, %v458_v58 }
 0x270   :  { %2109 = vmatmul.mubr.msk.f32.vlgmr.msra.gmra.mrb[10].mxu1 %vm179_vm1, %v334_v63 }
 0x271   :  { %2320 = vmatpush1.bf16.msra.mxu1 %v2939_v61  ;;  %617 = vmatprep.mubr.f32.mxu1 %v2750_v1 }
 0x272   :  { %2322 = vmatprep.subr.bf16.mxu1 %v2941_v0  ;;  %2314 = vmatprep.subr.bf16.mxu0 %v3000_v60 }
 0x275   :  { %2324 = vmatpush1.bf16.msra.mxu1 %v2945_v12 }
 0x276   :  { %2326 = vmatprep.subr.bf16.mxu1 %v2949_v13 }
 0x279   :  { %2328 = vmatpush1.bf16.msra.mxu1 %v2952_v18 }
 0x27a   :  { %2330 = vmatprep.subr.bf16.mxu1 %v2955_v19 }
 0x27d   :  { %2332 = vmatpush1.bf16.msra.mxu1 %v2958_v23 }
 0x27e   :  { %2350 = vmatprep.subr.bf16.mxu1 %v2973_v36 }
 0x280   :  { %2113 = vmatmul.mubr.msk.f32.vlgmr.msra.gmra.mrb[2].mxu1 %vm179_vm1, %v334_v63  ;;  %v457_v63 = vld [vmem:[#allocation3 + $0x1e0] sm:$0xff] }
 0x281   :  { %837 = vmatprep.mubr.f32.mxu1 %v2750_v1  ;;  %2352 = vmatpush1.bf16.msra.mxu1 %v2977_v41  ;;  %v3002_v3 = vpack.c.bf16 %v459_v2, %v457_v63 }
 0x282   :  { %2354 = vmatprep.subr.bf16.mxu1 %v2983_v47 }
 0x283   :  { %2316 = vmatpush1.bf16.msra.mxu0 %v3002_v3 }
 0x284   :  { %2334 = vmatprep.subr.bf16.mxu0 %v2882_v62 }
 0x285   :  { %2356 = vmatpush1.bf16.msra.mxu1 %v2985_v50 }
 0x286   :  { %2358 = vmatprep.subr.bf16.mxu1 %v2991_v53 }
 0x289   :  { %2360 = vmatpush1.bf16.msra.mxu1 %v2993_v56 }
 0x28a   :  { %2362 = vmatprep.subr.bf16.mxu1 %v3000_v60 }
 0x28d   :  { %2364 = vmatpush1.bf16.msra.mxu1 %v3002_v3 }
 0x28e   :  { %2366 = vmatprep.subr.bf16.mxu1 %v2926_v42 }
 0x2d5   :  { %v641_v51 = vpop.permute.xlu1 %640 }
 0x343   :  { %v420_v24 = vpop.f32.mrb[10].mxu1 }
 0x344   :  { %v422_v26 = vpop.f32.mrb[11].mxu1  ;;  %v421_v15 = vadd.f32 %v420_v24, %v3012_v10 }
 0x345   :  { %v423_v40 = vadd.f32 %v422_v26, %v2968_v28 }
 0x346   :  { %v2110_v17 = vmul.f32 -1.442695, %v421_v15 }
 0x347   :  { %v2111_v22 = vmul.f32 -1.442695, %v423_v40 }
 0x353   :  { %v619_v30 = vpop.f32.mrb[2].mxu1 }
 0x354   :  { %v621_v31 = vpop.f32.mrb[3].mxu1  ;;  %v2541_v14 = vadd.f32 %v619_v30, %v2935_v44 }
 0x355   :  { %v2971_v32 = vadd.f32 %v621_v31, %v2903_v11 }
 0x356   :  { %v2114_v16 = vmul.f32 -1.442695, %v2541_v14 }
 0x357   :  { %2589 = vtanh.f32 %v2971_v32  ;;  %v2115_v58 = vmul.f32 -1.442695, %v2971_v32 }
 0x358   :  { %2591 = vtanh.f32 %v423_v40 }
 0x359   :  { %2593 = vpow2.f32 %v2114_v16 }
 0x35a   :  { %2595 = vpow2.f32 %v2110_v17 }
 0x35b   :  { %2597 = vpow2.f32 %v2111_v22 }
 0x361   :  { %v2590_v57 = vpop.eup %2589 }
 0x362   :  { %645 = vrot.lane.b32.xlu0 %v2590_v57, %s2751_s22  ;;  %v2592_v4 = vpop.eup %2591 }
 0x363   :  { %v2594_v21 = vpop.eup %2593 }
 0x364   :  { %v629_v26 = vadd.f32 1.0, %v2594_v21  ;;  %v2596_v31 = vpop.eup %2595 }
 0x365   :  { %v428_v33 = vadd.f32 1.0, %v2596_v31  ;;  %v2598_v35 = vpop.eup %2597 }
 0x366   :  { %439 = vrot.lane.b32.xlu0 %v2592_v4, %s2751_s22  ;;  %2599 = vrcp.f32 %v629_v26  ;;  %v434_v45 = vadd.f32 1.0, %v2598_v35 }
 0x367   :  { %2601 = vrcp.f32 %v428_v33 }
 0x368   :  { %2603 = vrcp.f32 %v434_v45 }
 0x370   :  { %v2600_v37 = vpop.eup %2599 }
 0x371   :  { %v2602_v24 = vpop.eup %2601  ;;  %v643_v52 = vmul.f32 %v2600_v37, %v641_v51 }
 0x372   :  { %v2604_v48 = vpop.eup %2603 }
 0x3d4   :  { %v646_v27 = vpop.permute.xlu0 %645 }
 0x3d5   :  { %v648_v39 = vmul.f32 %v2600_v37, %v646_v27 }
 0x3d7   :  { %650 = vrot.lane.b32.xlu1 %v648_v39, %s2751_s22 }
 0x3d8   :  { %v440_v30 = vpop.permute.xlu0 %439 }
 0x3d9   :  { %v442_v46 = vmul.f32 %v2602_v24, %v440_v30 }
 0x3db   :  { %2605 = vtanh.f32 %v442_v46 }
 0x3e5   :  { %v2606_v40 = vpop.eup %2605 }
 0x3e6   :  { %v444_v49 = vmul.f32 %v2606_v40, %v2604_v48 }
 0x3e8   :  { %2112 = vmatmul.mubr.msk.f32.vlgmr.msra.gmra.mrb[10].mxu0 %vm179_vm1, %v444_v49 }
 0x3e9   :  { %2336 = vmatpush1.bf16.msra.mxu0 %v2884_v5  ;;  %727 = vmatprep.mubr.f32.mxu0 %v2750_v1 }
 0x3ea   :  { %2338 = vmatprep.subr.bf16.mxu0 %v2886_v6 }
 0x3ed   :  { %2340 = vmatpush1.bf16.msra.mxu0 %v2906_v20 }
 0x3ee   :  { %2342 = vmatprep.subr.bf16.mxu0 %v2910_v25 }
 0x3f1   :  { %2344 = vmatpush1.bf16.msra.mxu0 %v2912_v29 }
 0x3f2   :  { %2346 = vmatprep.subr.bf16.mxu0 %v2918_v34 }
 0x3f5   :  { %2348 = vmatpush1.bf16.msra.mxu0 %v2921_v38 }
 0x3f6   :  { %2398 = vmatprep.subr.bf16.mxu0 %v2973_v36 }
 0x449   :  { %v651_v54 = vpop.permute.xlu1 %650 }
 0x44a   :  { %v3027_v55 = vadd.f32 %v651_v54, %v643_v52 }
 0x44c   :  { %2607 = vtanh.f32 %v3027_v55 }
 0x44d   :  { %2609 = vpow2.f32 %v2115_v58 }
 0x456   :  { %v2608_v57 = vpop.eup %2607 }
 0x457   :  { %656 = vrot.lane.b32.xlu1 %v2608_v57, %s2751_s22  ;;  %v2610_v59 = vpop.eup %2609 }
 0x458   :  { %v635_v63 = vadd.f32 1.0, %v2610_v59 }
 0x45a   :  { %2611 = vrcp.f32 %v635_v63 }
 0x45b   :  { %750 = vrot.lane.b32.xlu1 %v442_v46, %s2751_s22 }
 0x464   :  { %v2612_v2 = vpop.eup %2611 }
 0x4c9   :  { %v657_v4 = vpop.permute.xlu1 %656 }
 0x4ca   :  { %v659_v14 = vmul.f32 %v2612_v2, %v657_v4 }
 0x4cc   :  { %2116 = vmatmul.mubr.msk.f32.vlgmr.msra.gmra.mrb[10].mxu0 %vm179_vm1, %v659_v14 }
 0x4cd   :  { %2400 = vmatpush1.bf16.msra.mxu0 %v2977_v41  ;;  %1122 = vmatprep.mubr.f32.mxu0 %v2750_v1  ;;  %v751_v27 = vpop.permute.xlu1 %750 }
 0x4ce   :  { %2402 = vmatprep.subr.bf16.mxu0 %v2983_v47 }
 0x4d1   :  { %2404 = vmatpush1.bf16.msra.mxu0 %v2985_v50 }
 0x4d2   :  { %2406 = vmatprep.subr.bf16.mxu0 %v2991_v53 }
 0x4d5   :  { %2408 = vmatpush1.bf16.msra.mxu0 %v2993_v56 }
 0x4d6   :  { %2410 = vmatprep.subr.bf16.mxu0 %v3000_v60 }
 0x4d9   :  { %2412 = vmatpush1.bf16.msra.mxu0 %v3002_v3 }
 0x4da   :  { %2430 = vmatprep.subr.bf16.mxu0 %v2882_v62 }
 0x59f   :  { %v729_v32 = vpop.f32.mrb[10].mxu0 }
 0x5a0   :  { %v731_v15 = vpop.f32.mrb[11].mxu0  ;;  %v734_v21 = vadd.f32 %v729_v32, %v3012_v10 }
 0x5a1   :  { %v735_v16 = vadd.f32 %v731_v15, %v2968_v28 }
 0x5a2   :  { %v2117_v22 = vmul.f32 -1.442695, %v734_v21 }
 0x5a3   :  { %2613 = vtanh.f32 %v735_v16  ;;  %v2118_v46 = vmul.f32 -1.442695, %v735_v16 }
 0x5a4   :  { %2615 = vpow2.f32 %v2117_v22 }
 0x5ad   :  { %v2614_v17 = vpop.eup %2613 }
 0x5ae   :  { %755 = vrot.lane.b32.xlu0 %v2614_v17, %s2751_s22  ;;  %v2616_v26 = vpop.eup %2615 }
 0x5af   :  { %v739_v31 = vadd.f32 1.0, %v2616_v26 }
 0x5b1   :  { %2617 = vrcp.f32 %v739_v31 }
 0x5bb   :  { %v2618_v33 = vpop.eup %2617 }
 0x5bc   :  { %v753_v39 = vmul.f32 %v2618_v33, %v751_v27 }
 0x620   :  { %v756_v35 = vpop.permute.xlu0 %755 }
 0x621   :  { %v758_v37 = vmul.f32 %v2618_v33, %v756_v35 }
 0x623   :  { %760 = vrot.lane.b32.xlu0 %v758_v37, %s2751_s22 }
 0x695   :  { %v761_v45 = vpop.permute.xlu0 %760 }
 0x696   :  { %v3047_v24 = vadd.f32 %v761_v45, %v753_v39 }
 0x698   :  { %2619 = vtanh.f32 %v3047_v24 }
 0x699   :  { %2621 = vpow2.f32 %v2118_v46 }
 0x6a2   :  { %v2620_v30 = vpop.eup %2619 }
 0x6a3   :  { %766 = vrot.lane.b32.xlu1 %v2620_v30, %s2751_s22  ;;  %v2622_v48 = vpop.eup %2621 }
 0x6a4   :  { %v745_v40 = vadd.f32 1.0, %v2622_v48 }
 0x6a6   :  { %2623 = vrcp.f32 %v745_v40 }
 0x6b0   :  { %v2624_v49 = vpop.eup %2623 }
 0x715   :  { %v767_v51 = vpop.permute.xlu1 %766 }
 0x716   :  { %v769_v52 = vmul.f32 %v2624_v49, %v767_v51 }
 0x718   :  { %2119 = vmatmul.mubr.msk.f32.vlgmr.msra.gmra.mrb[12].mxu1 %vm179_vm1, %v769_v52 }
 0x719   :  { %2368 = vmatpush1.bf16.msra.mxu1 %v2939_v61  ;;  %910 = vmatprep.mubr.f32.mxu1 %v2750_v1 }
 0x71a   :  { %2370 = vmatprep.subr.bf16.mxu1 %v2941_v0 }
 0x71d   :  { %2372 = vmatpush1.bf16.msra.mxu1 %v2945_v12 }
 0x71e   :  { %2374 = vmatprep.subr.bf16.mxu1 %v2949_v13 }
 0x721   :  { %2376 = vmatpush1.bf16.msra.mxu1 %v2952_v18 }
 0x722   :  { %2378 = vmatprep.subr.bf16.mxu1 %v2955_v19 }
 0x725   :  { %2380 = vmatpush1.bf16.msra.mxu1 %v2958_v23 }
 0x726   :  { %2382 = vmatprep.subr.bf16.mxu1 %v2882_v62 }
 0x728   :  { %2120 = vmatmul.mubr.msk.f32.vlgmr.msra.gmra.mrb[4].mxu1 %vm179_vm1, %v659_v14 }
 0x729   :  { %2384 = vmatpush1.bf16.msra.mxu1 %v2884_v5  ;;  %1016 = vmatprep.mubr.f32.mxu1 %v2750_v1 }
 0x72a   :  { %2386 = vmatprep.subr.bf16.mxu1 %v2886_v6 }
 0x72d   :  { %2388 = vmatpush1.bf16.msra.mxu1 %v2906_v20 }
 0x72e   :  { %2390 = vmatprep.subr.bf16.mxu1 %v2910_v25 }
 0x731   :  { %2392 = vmatpush1.bf16.msra.mxu1 %v2912_v29 }
 0x732   :  { %2394 = vmatprep.subr.bf16.mxu1 %v2918_v34 }
 0x735   :  { %2396 = vmatpush1.bf16.msra.mxu1 %v2921_v38 }
 0x736   :  { %2414 = vmatprep.subr.bf16.mxu1 %v2926_v42 }
 0x7fb   :  { %v912_v54 = vpop.f32.mrb[4].mxu1 }
 0x7fc   :  { %v914_v57 = vpop.f32.mrb[5].mxu1  ;;  %v2543_v63 = vadd.f32 %v912_v54, %v2935_v44 }
 0x7fd   :  { %v2544_v58 = vadd.f32 %v914_v57, %v2903_v11 }
 0x7fe   :  { %v2121_v2 = vmul.f32 -1.442695, %v2543_v63 }
 0x7ff   :  { %2625 = vtanh.f32 %v2544_v58  ;;  %v2122_v31 = vmul.f32 -1.442695, %v2544_v58 }
 0x800   :  { %2627 = vpow2.f32 %v2121_v2 }
 0x809   :  { %v2626_v59 = vpop.eup %2625 }
 0x80a   :  { %934 = vrot.lane.b32.xlu0 %v2626_v59, %s2751_s22  ;;  %v2628_v4 = vpop.eup %2627 }
 0x80b   :  { %v922_v14 = vadd.f32 1.0, %v2628_v4 }
 0x80d   :  { %2629 = vrcp.f32 %v922_v14 }
 0x817   :  { %v2630_v32 = vpop.eup %2629 }
 0x818   :  { %v932_v17 = vmul.f32 %v2630_v32, %v3027_v55 }
 0x87c   :  { %v935_v15 = vpop.permute.xlu0 %934 }
 0x87d   :  { %v937_v16 = vmul.f32 %v2630_v32, %v935_v15 }
 0x87f   :  { %939 = vrot.lane.b32.xlu1 %v937_v16, %s2751_s22 }
 0x8f1   :  { %v940_v21 = vpop.permute.xlu1 %939 }
 0x8f2   :  { %v3076_v22 = vadd.f32 %v940_v21, %v932_v17 }
 0x8f4   :  { %2631 = vtanh.f32 %v3076_v22 }
 0x8f5   :  { %2633 = vpow2.f32 %v2122_v31 }
 0x8fe   :  { %v2632_v26 = vpop.eup %2631 }
 0x8ff   :  { %945 = vrot.lane.b32.xlu0 %v2632_v26, %s2751_s22  ;;  %v2634_v33 = vpop.eup %2633 }
 0x900   :  { %v928_v35 = vadd.f32 1.0, %v2634_v33 }
 0x902   :  { %2635 = vrcp.f32 %v928_v35 }
 0x90c   :  { %v2636_v37 = vpop.eup %2635 }
 0x971   :  { %v946_v27 = vpop.permute.xlu0 %945 }
 0x972   :  { %v948_v39 = vmul.f32 %v2636_v37, %v946_v27 }
 0x974   :  { %2123 = vmatmul.mubr.msk.f32.vlgmr.msra.gmra.mrb[12].mxu1 %vm179_vm1, %v948_v39 }
 0x975   :  { %2416 = vmatpush1.bf16.msra.mxu1 %v2939_v61  ;;  %1195 = vmatprep.mubr.f32.mxu1 %v2750_v1 }
 0x976   :  { %2418 = vmatprep.subr.bf16.mxu1 %v2941_v0 }
 0x979   :  { %2420 = vmatpush1.bf16.msra.mxu1 %v2945_v12 }
 0x97a   :  { %2422 = vmatprep.subr.bf16.mxu1 %v2949_v13 }
 0x97d   :  { %2424 = vmatpush1.bf16.msra.mxu1 %v2952_v18 }
 0x97e   :  { %2426 = vmatprep.subr.bf16.mxu1 %v2955_v19 }
 0x981   :  { %2428 = vmatpush1.bf16.msra.mxu1 %v2958_v23 }
 0x982   :  { %2462 = vmatprep.subr.bf16.mxu1 %v2926_v42 }
 0x984   :  { %2127 = vmatmul.mubr.msk.f32.vlgmr.msra.gmra.mrb[6].mxu1 %vm179_vm1, %v948_v39 }
 0x985   :  { %2464 = vmatpush1.bf16.msra.mxu1 %v2939_v61  ;;  %1480 = vmatprep.mubr.f32.mxu1 %v2750_v1 }
 0x986   :  { %2466 = vmatprep.subr.bf16.mxu1 %v2941_v0 }
 0x989   :  { %2468 = vmatpush1.bf16.msra.mxu1 %v2945_v12 }
 0x98a   :  { %2470 = vmatprep.subr.bf16.mxu1 %v2949_v13 }
 0x98d   :  { %2472 = vmatpush1.bf16.msra.mxu1 %v2952_v18 }
 0x98e   :  { %2474 = vmatprep.subr.bf16.mxu1 %v2955_v19 }
 0x991   :  { %2476 = vmatpush1.bf16.msra.mxu1 %v2958_v23 }
 0xa47   :  { %v1018_v55 = vpop.f32.mrb[12].mxu1 }
 0xa48   :  { %v1020_v42 = vpop.f32.mrb[13].mxu1  ;;  %v1023_v18 = vadd.f32 %v1018_v55, %v3012_v10 }
 0xa49   :  { %v1024_v45 = vadd.f32 %v1020_v42, %v2968_v28 }
 0xa4a   :  { %v2124_v19 = vmul.f32 -1.442695, %v1023_v18 }
 0xa4b   :  { %2637 = vtanh.f32 %v1024_v45  ;;  %v2125_v26 = vmul.f32 -1.442695, %v1024_v45 }
 0xa55   :  { %v2638_v61 = vpop.eup %2637 }
 0xa56   :  { %1040 = vrot.lane.b32.xlu1 %v2638_v61, %s2751_s22 }
 0xa57   :  { %v1197_v30 = vpop.f32.mrb[6].mxu1 }
 0xa58   :  { %v1199_v0 = vpop.f32.mrb[7].mxu1  ;;  %v2545_v23 = vadd.f32 %v1197_v30, %v2935_v44 }
 0xa59   :  { %v2546_v12 = vadd.f32 %v1199_v0, %v2903_v11 }
 0xa5a   :  { %v2128_v48 = vmul.f32 -1.442695, %v2545_v23 }
 0xa5b   :  { %2639 = vtanh.f32 %v2546_v12  ;;  %v2129_v31 = vmul.f32 -1.442695, %v2546_v12 }
 0xa5c   :  { %2641 = vpow2.f32 %v2124_v19 }
 0xa5d   :  { %2643 = vpow2.f32 %v2128_v48 }
 0xa65   :  { %v2640_v13 = vpop.eup %2639 }
 0xa66   :  { %1219 = vrot.lane.b32.xlu0 %v2640_v13, %s2751_s22  ;;  %v2642_v46 = vpop.eup %2641 }
 0xa67   :  { %v1028_v40 = vadd.f32 1.0, %v2642_v46  ;;  %v2644_v49 = vpop.eup %2643 }
 0xa68   :  { %v1207_v57 = vadd.f32 1.0, %v2644_v49 }
 0xa69   :  { %2645 = vrcp.f32 %v1028_v40 }
 0xa6a   :  { %2647 = vrcp.f32 %v1207_v57 }
 0xa73   :  { %v2646_v51 = vpop.eup %2645 }
 0xa74   :  { %v2648_v58 = vpop.eup %2647  ;;  %v1038_v2 = vmul.f32 %v2646_v51, %v3047_v24 }
 0xa75   :  { %v1217_v15 = vmul.f32 %v2648_v58, %v3076_v22 }
 0xac8   :  { %v1041_v52 = vpop.permute.xlu1 %1040 }
 0xac9   :  { %v1043_v54 = vmul.f32 %v2646_v51, %v1041_v52 }
 0xacb   :  { %1045 = vrot.lane.b32.xlu1 %v1043_v54, %s2751_s22 }
 0xad8   :  { %v1220_v59 = vpop.permute.xlu0 %1219 }
 0xad9   :  { %v1222_v63 = vmul.f32 %v2648_v58, %v1220_v59 }
 0xadb   :  { %1224 = vrot.lane.b32.xlu0 %v1222_v63, %s2751_s22 }
 0xb3d   :  { %v1046_v4 = vpop.permute.xlu1 %1045 }
 0xb3e   :  { %v3108_v14 = vadd.f32 %v1046_v4, %v1038_v2 }
 0xb40   :  { %2649 = vtanh.f32 %v3108_v14 }
 0xb4a   :  { %v2650_v32 = vpop.eup %2649 }
 0xb4b   :  { %1051 = vrot.lane.b32.xlu1 %v2650_v32, %s2751_s22 }
 0xb4d   :  { %v1225_v16 = vpop.permute.xlu0 %1224 }
 0xb4e   :  { %v3113_v17 = vadd.f32 %v1225_v16, %v1217_v15 }
 0xb50   :  { %2651 = vtanh.f32 %v3113_v17 }
 0xb51   :  { %2653 = vpow2.f32 %v2125_v26 }
 0xb52   :  { %2655 = vpow2.f32 %v2129_v31 }
 0xb5a   :  { %v2652_v21 = vpop.eup %2651 }
 0xb5b   :  { %1230 = vrot.lane.b32.xlu0 %v2652_v21, %s2751_s22  ;;  %v2654_v24 = vpop.eup %2653 }
 0xb5c   :  { %v1034_v33 = vadd.f32 1.0, %v2654_v24  ;;  %v2656_v35 = vpop.eup %2655 }
 0xb5d   :  { %v1213_v22 = vadd.f32 1.0, %v2656_v35 }
 0xb5e   :  { %2657 = vrcp.f32 %v1034_v33 }
 0xb5f   :  { %2659 = vrcp.f32 %v1213_v22  ;;  %v1625_v22 = vld [vmem:[#allocation3 + $0x200] sm:$0xff] }
 0xb68   :  { %v2658_v37 = vpop.eup %2657 }
 0xb69   :  { %v2660_v55 = vpop.eup %2659 }
 0xbbd   :  { %v1052_v27 = vpop.permute.xlu1 %1051 }
 0xbbe   :  { %v1054_v39 = vmul.f32 %v2658_v37, %v1052_v27 }
 0xbc0   :  { %2126 = vmatmul.mubr.msk.f32.vlgmr.msra.gmra.mrb[12].mxu0 %vm179_vm1, %v1054_v39  ;;  %v1626_v39 = vld [vmem:[#allocation3 + $0x208] sm:$0xff] }
 0xbc1   :  { %2432 = vmatpush1.bf16.msra.mxu0 %v2884_v5  ;;  %1301 = vmatprep.mubr.f32.mxu0 %v2750_v1 }
 0xbc2   :  { %2434 = vmatprep.subr.bf16.mxu0 %v2886_v6 }
 0xbc5   :  { %2436 = vmatpush1.bf16.msra.mxu0 %v2906_v20 }
 0xbc6   :  { %2438 = vmatprep.subr.bf16.mxu0 %v2910_v25 }
 0xbc9   :  { %2440 = vmatpush1.bf16.msra.mxu0 %v2912_v29 }
 0xbca   :  { %2442 = vmatprep.subr.bf16.mxu0 %v2918_v34 }
 0xbcd   :  { %v1231_v42 = vpop.permute.xlu0 %1230  ;;  %2444 = vmatpush1.bf16.msra.mxu0 %v2921_v38 }
 0xbce   :  { %v1233_v45 = vmul.f32 %v2660_v55, %v1231_v42  ;;  %2446 = vmatprep.subr.bf16.mxu0 %v2973_v36  ;;  %v1627_v42 = vld [vmem:[#allocation3 + $0x210] sm:$0xff] }
 0xbd0   :  { %2130 = vmatmul.mubr.msk.f32.vlgmr.msra.gmra.mrb[12].mxu0 %vm179_vm1, %v1233_v45  ;;  %2134 = vmatmul.mubr.msk.f32.vlgmr.msra.gmra.mrb[8].mxu1 %vm179_vm1, %v1233_v45  ;;  %v1630_v45 = vld [vmem:[#allocation3 + $0x228] sm:$0xff] }
 0xbd1   :  { %2448 = vmatpush1.bf16.msra.mxu0 %v2977_v41  ;;  %1407 = vmatprep.mubr.f32.mxu0 %v2750_v1 }
 0xbd2   :  { %2450 = vmatprep.subr.bf16.mxu0 %v2983_v47 }
 0xbd5   :  { %2452 = vmatpush1.bf16.msra.mxu0 %v2985_v50 }
 0xbd6   :  { %2454 = vmatprep.subr.bf16.mxu0 %v2991_v53 }
 0xbd9   :  { %2456 = vmatpush1.bf16.msra.mxu0 %v2993_v56 }
 0xbda   :  { %2458 = vmatprep.subr.bf16.mxu0 %v3000_v60 }
 0xbdd   :  { %2460 = vmatpush1.bf16.msra.mxu0 %v3002_v3 }
 0xbde   :  { %2478 = vmatprep.subr.bf16.mxu0 %v2882_v62 }
 0xca3   :  { %v1303_v36 = vpop.f32.mrb[12].mxu0  ;;  %v1482_v61 = vpop.f32.mrb[8].mxu1 }
 0xca4   :  { %v1305_v30 = vpop.f32.mrb[13].mxu0  ;;  %v1484_v41 = vpop.f32.mrb[9].mxu1  ;;  %v1308_v56 = vadd.f32 %v1303_v36, %v3012_v10  ;;  %v2547_v62 = vadd.f32 %v1482_v61, %v2935_v44  ;;  %v1632_v36 = vld [vmem:[#allocation3 + $0x238] sm:$0xff]  ;;  %v2495_v61 = vpack.c.bf16 %v1627_v42, %v1625_v22  ;;  %v1740_v22 = vld [vmem:[%s3325_s3 + $0x50] sm:$0xff]  ;;  %v1758_v42 = vld [vmem:[%s3325_s3 + $0xe0] sm:$0xff] }
 0xca5   :  { %v1309_v0 = vadd.f32 %v1305_v30, %v2968_v28  ;;  %v2548_v47 = vadd.f32 %v1484_v41, %v2903_v11  ;;  %v2497_v30 = vpack.c.bf16 %v1632_v36, %v1630_v45  ;;  %v1631_v41 = vld [vmem:[#allocation3 + $0x230] sm:$0xff]  ;;  %v1759_v45 = vld [vmem:[%s3325_s3 + $0xe8] sm:$0xff] }
 0xca6   :  { %v2131_v60 = vmul.f32 -1.442695, %v1308_v56  ;;  %v2135_v3 = vmul.f32 -1.442695, %v2547_v62  ;;  %v1633_v56 = vld [vmem:[#allocation3 + $0x240] sm:$0xff]  ;;  %v1638_v62 = vld [vmem:[#allocation3 + $0x268] sm:$0xff] }
 0xca7   :  { %2661 = vtanh.f32 %v1309_v0  ;;  %v2132_v2 = vmul.f32 -1.442695, %v1309_v0  ;;  %v1634_v0 = vld [vmem:[#allocation3 + $0x248] sm:$0xff] }
 0xca8   :  { %2663 = vtanh.f32 %v2548_v47 }
 0xca9   :  { %2665 = vpow2.f32 %v2131_v60  ;;  %v1635_v60 = vld [vmem:[#allocation3 + $0x250] sm:$0xff] }
 0xcaa   :  { %2667 = vpow2.f32 %v2135_v3  ;;  %v1640_v3 = vld [vmem:[#allocation3 + $0x278] sm:$0xff] }
 0xcb1   :  { %v2662_v50 = vpop.eup %2661 }
 0xcb2   :  { %1325 = vrot.lane.b32.xlu1 %v2662_v50, %s2751_s22  ;;  %v2664_v53 = vpop.eup %2663 }
 0xcb3   :  { %1504 = vrot.lane.b32.xlu0 %v2664_v53, %s2751_s22  ;;  %v2666_v12 = vpop.eup %2665 }
 0xcb4   :  { %v1313_v13 = vadd.f32 1.0, %v2666_v12  ;;  %v2668_v18 = vpop.eup %2667  ;;  %v2503_v12 = vpack.c.bf16 %v1635_v60, %v1633_v56  ;;  %v1743_v56 = vld [vmem:[%s3325_s3 + $0x68] sm:$0xff] }
 0xcb5   :  { %v1492_v11 = vadd.f32 1.0, %v2668_v18  ;;  %v1637_v18 = vld [vmem:[#allocation3 + $0x260] sm:$0xff] }
 0xcb6   :  { %2669 = vrcp.f32 %v1313_v13  ;;  %v2505_v13 = vpack.c.bf16 %v1640_v3, %v1638_v62  ;;  %v1761_v62 = vld [vmem:[%s3325_s3 + $0xf8] sm:$0xff]  ;;  %v1744_v3 = vld [vmem:[%s3325_s3 + $0x70] sm:$0xff] }
 0xcb7   :  { %2671 = vrcp.f32 %v1492_v11  ;;  %v1639_v11 = vld [vmem:[#allocation3 + $0x270] sm:$0xff] }
 0xcc0   :  { %v2670_v19 = vpop.eup %2669 }
 0xcc1   :  { %v2672_v48 = vpop.eup %2671  ;;  %v1323_v44 = vmul.f32 %v2670_v19, %v3108_v14  ;;  %v2136_v14 = vmul.f32 -1.442695, %v2548_v47  ;;  %v1636_v47 = vld [vmem:[#allocation3 + $0x258] sm:$0xff] }
 0xcc2   :  { %v1502_v54 = vmul.f32 %v2672_v48, %v3113_v17  ;;  %v2501_v53 = vpack.c.bf16 %v1636_v47, %v1634_v0 }
 0xd24   :  { %v1326_v23 = vpop.permute.xlu1 %1325 }
 0xd25   :  { %v1328_v46 = vmul.f32 %v2670_v19, %v1326_v23  ;;  %v1505_v40 = vpop.permute.xlu0 %1504  ;;  %v2507_v19 = vpack.c.bf16 %v1639_v11, %v1637_v18  ;;  %v2140_v11 = vld [vmem:[%s3326_s4 + $0x2] ss:$8 sm:$0x3] }
 0xd26   :  { %v1507_v49 = vmul.f32 %v2672_v48, %v1505_v40  ;;  %v1746_v40 = vld [vmem:[%s3325_s3 + $0x80] sm:$0xff] }
 0xd27   :  { %1330 = vrot.lane.b32.xlu1 %v1328_v46, %s2751_s22 }
 0xd28   :  { %1509 = vrot.lane.b32.xlu0 %v1507_v49, %s2751_s22  ;;  %v1747_v49 = vld [vmem:[%s3325_s3 + $0x88] sm:$0xff] }
 0xd99   :  { %v1331_v51 = vpop.permute.xlu1 %1330 }
 0xd9a   :  { %v3147_v52 = vadd.f32 %v1331_v51, %v1323_v44  ;;  %v1510_v57 = vpop.permute.xlu0 %1509  ;;  %v1730_v44 = vld [vmem:[%s3325_s3] sm:$0xff]  ;;  %v2509_v51 = vpack.c.bf16 %v1747_v49, %v1746_v40 }
 0xd9b   :  { %v1512_v58 = vadd.f32 %v1510_v57, %v1502_v54  ;;  %v1748_v54 = vld [vmem:[%s3325_s3 + $0x90] sm:$0xff]  ;;  %v1749_v57 = vld [vmem:[%s3325_s3 + $0x98] sm:$0xff] }
 0xd9c   :  { %2673 = vtanh.f32 %v3147_v52  ;;  %2510 = vmatprep.subr.bf16.mxu1 %v2509_v51 }
 0xd9d   :  { %2675 = vtanh.f32 %v1512_v58 }
 0xd9e   :  { %2677 = vpow2.f32 %v2132_v2  ;;  %v1733_v2 = vld [vmem:[%s3325_s3 + $0x18] sm:$0xff] }
 0xd9f   :  { %2679 = vpow2.f32 %v2136_v14  ;;  %v1751_v14 = vld [vmem:[%s3325_s3 + $0xa8] sm:$0xff] }
 0xda6   :  { %v2674_v59 = vpop.eup %2673 }
 0xda7   :  { %1336 = vrot.lane.b32.xlu1 %v2674_v59, %s2751_s22  ;;  %v2676_v63 = vpop.eup %2675  ;;  %v2513_v59 = vpack.c.bf16 %v1749_v57, %v1748_v54 }
 0xda8   :  { %1515 = vrot.lane.b32.xlu0 %v2676_v63, %s2751_s22  ;;  %v2678_v4 = vpop.eup %2677  ;;  %v1732_v63 = vld [vmem:[%s3325_s3 + $0x10] sm:$0xff] }
 0xda9   :  { %v1319_v32 = vadd.f32 1.0, %v2678_v4  ;;  %v2680_v15 = vpop.eup %2679  ;;  %v1750_v4 = vld [vmem:[%s3325_s3 + $0xa0] sm:$0xff] }
 0xdaa   :  { %v1498_v26 = vadd.f32 1.0, %v2680_v15  ;;  %v2517_v15 = vpack.c.bf16 %v1751_v14, %v1750_v4 }
 0xdab   :  { %2681 = vrcp.f32 %v1319_v32  ;;  %v2515_v32 = vpack.c.bf16 %v1733_v2, %v1732_v63 }
 0xdac   :  { %2683 = vrcp.f32 %v1498_v26  ;;  %v1753_v26 = vld [vmem:[%s3325_s3 + $0xb8] sm:$0xff] }
 0xdb5   :  { %v2682_v16 = vpop.eup %2681 }
 0xdb6   :  { %v2684_v31 = vpop.eup %2683 }
 0xe19   :  { %v1337_v21 = vpop.permute.xlu1 %1336 }
 0xe1a   :  { %v1339_v17 = vmul.f32 %v2682_v16, %v1337_v21  ;;  %v1516_v24 = vpop.permute.xlu0 %1515  ;;  %v1734_v16 = vld [vmem:[%s3325_s3 + $0x20] sm:$0xff]  ;;  %v1735_v21 = vld [vmem:[%s3325_s3 + $0x28] sm:$0xff] }
 0xe1b   :  { %v1518_v33 = vmul.f32 %v2684_v31, %v1516_v24  ;;  %v2519_v24 = vpack.c.bf16 %v1735_v21, %v1734_v16 }
 0xe1c   :  { %2133 = vmatmul.mubr.msk.f32.vlgmr.msra.gmra.mrb[14].mxu0 %vm179_vm1, %v1339_v17  ;;  %v1752_v17 = vld [vmem:[%s3325_s3 + $0xb0] sm:$0xff] }
 0xe1d   :  { %2480 = vmatpush1.bf16.msra.mxu0 %v2884_v5  ;;  %1586 = vmatprep.mubr.f32.mxu0 %v2750_v1  ;;  %v2521_v31 = vpack.c.bf16 %v1753_v26, %v1752_v17  ;;  %v1834_v26 = vld [vmem:[%s3326_s4 + $0x10] sm:$0xff] }
 0xe1e   :  { %2482 = vmatprep.subr.bf16.mxu0 %v2886_v6 }
 0xe21   :  { %2484 = vmatpush1.bf16.msra.mxu0 %v2906_v20 }
 0xe22   :  { %2486 = vmatprep.subr.bf16.mxu0 %v2910_v25 }
 0xe25   :  { %2488 = vmatpush1.bf16.msra.mxu0 %v2912_v29 }
 0xe26   :  { %2490 = vmatprep.subr.bf16.mxu0 %v2918_v34 }
 0xe29   :  { %2492 = vmatpush1.bf16.msra.mxu0 %v2921_v38 }
 0xe2c   :  { %2137 = vmatmul.mubr.msk.f32.vlgmr.msra.gmra.mrb[14].mxu0 %vm179_vm1, %v1518_v33  ;;  %v1736_v33 = vld [vmem:[%s3325_s3 + $0x30] sm:$0xff] }
 0xe2d   :  { %1721 = vmatprep.mubr.f32.mxu0 %v2750_v1 }
 0xeff   :  { %v1588_v5 = vpop.f32.mrb[14].mxu0 }
 0xf00   :  { %v1590_v6 = vpop.f32.mrb[15].mxu0  ;;  %v1593_v25 = vadd.f32 %v1588_v5, %v3012_v10  ;;  %v1629_v10 = vld [vmem:[#allocation3 + $0x220] sm:$0xff]  ;;  %v1737_v5 = vld [vmem:[%s3325_s3 + $0x38] sm:$0xff] }
 0xf01   :  { %v3165_v35 = vadd.f32 %v1590_v6, %v2968_v28  ;;  %v1628_v28 = vld [vmem:[#allocation3 + $0x218] sm:$0xff]  ;;  %v2499_v50 = vpack.c.bf16 %v1631_v41, %v1629_v10 }
 0xf02   :  { %v2138_v29 = vmul.f32 -1.442695, %v1593_v25  ;;  %v2493_v55 = vpack.c.bf16 %v1628_v28, %v1626_v39  ;;  %v1755_v25 = vld [vmem:[%s3325_s3 + $0xc8] sm:$0xff] }
 0xf03   :  { %2685 = vtanh.f32 %v3165_v35 }
 0xf04   :  { %2687 = vpow2.f32 %v2138_v29  ;;  %2494 = vmatprep.subr.bf16.mxu0 %v2493_v55  ;;  %v2523_v29 = vpack.c.bf16 %v1737_v5, %v1736_v33  ;;  %v1741_v55 = vld [vmem:[%s3325_s3 + $0x58] sm:$0xff] }
 0xf05   :  { %2496 = vmatpush1.bf16.msra.mxu0 %v2495_v61  ;;  %v2531_v36 = vpack.c.bf16 %v1741_v55, %v1740_v22  ;;  %v2533_v61 = vpack.c.bf16 %v1759_v45, %v1758_v42 }
 0xf06   :  { %2498 = vmatprep.subr.bf16.mxu0 %v2497_v30  ;;  %v2139_v30 = vmul.f32 -1.442695, %v3165_v35  ;;  %v1760_v35 = vld [vmem:[%s3325_s3 + $0xf0] sm:$0xff] }
 0xf09   :  { %2500 = vmatpush1.bf16.msra.mxu0 %v2499_v50 }
 0xf0a   :  { %2502 = vmatprep.subr.bf16.mxu0 %v2501_v53  ;;  %v1742_v53 = vld [vmem:[%s3325_s3 + $0x60] sm:$0xff] }
 0xf0b   :  { %v2535_v60 = vpack.c.bf16 %v1743_v56, %v1742_v53 }
 0xf0d   :  { %v2686_v20 = vpop.eup %2685  ;;  %2504 = vmatpush1.bf16.msra.mxu0 %v2503_v12  ;;  %v2537_v12 = vpack.c.bf16 %v1761_v62, %v1760_v35 }
 0xf0e   :  { %1610 = vrot.lane.b32.xlu1 %v2686_v20, %s2751_s22  ;;  %v2688_v34 = vpop.eup %2687  ;;  %2506 = vmatprep.subr.bf16.mxu0 %v2505_v13  ;;  %v1754_v20 = vld [vmem:[%s3325_s3 + $0xc0] sm:$0xff]  ;;  %v1745_v13 = vld [vmem:[%s3325_s3 + $0x78] sm:$0xff] }
 0xf0f   :  { %v1598_v38 = vadd.f32 1.0, %v2688_v34  ;;  %v2525_v34 = vpack.c.bf16 %v1755_v25, %v1754_v20  ;;  %v2539_v18 = vpack.c.bf16 %v1745_v13, %v1744_v3  ;;  %v1957_v3 = vld [vmem:[%s3326_s4 + $0x4] ss:$0 sm:$0xff] }
 0xf11   :  { %2689 = vrcp.f32 %v1598_v38  ;;  %2508 = vmatpush1.bf16.msra.mxu0 %v2507_v19  ;;  %v1738_v38 = vld [vmem:[%s3325_s3 + $0x40] sm:$0xff]  ;;  %v1647_v19 = vrot.slane %v2140_v11, %v2932_v43 }
 0xf1b   :  { %v2690_v37 = vpop.eup %2689 }
 0xf1c   :  { %v1608_v23 = vmul.f32 %v2690_v37, %v3147_v52  ;;  %v1731_v52 = vld [vmem:[%s3325_s3 + $0x8] sm:$0xff] }
 0xf1d   :  { %v2511_v58 = vpack.c.bf16 %v1731_v52, %v1730_v44  ;;  %v2752_v52 = vmov 1966171168  }
 0xf1e   :  { %v1838_v54 = vunpack.c.l.s4 %v2752_v52 }
 0xf1f   :  { %2512 = vmatpush3.bf16.msra.mxu1 %v2511_v58 }
 0xf20   :  { %2514 = vmatprep.subr.bf16.mxu1 %v2513_v59  ;;  %v1839_v58 = vunpack.c.0.s8 %v1838_v54  ;;  %v1762_v59 = vld [vmem:[%s3326_s4 + $0x3] ss:$0 sm:$0xff] }
 0xf23   :  { %2516 = vmatpush3.bf16.msra.mxu1 %v2515_v32 }
 0xf24   :  { %2518 = vmatprep.subr.bf16.mxu1 %v2517_v15 }
 0xf27   :  { %2520 = vmatpush3.bf16.msra.mxu1 %v2519_v24 }
 0xf28   :  { %2522 = vmatprep.subr.bf16.mxu1 %v2521_v31 }
 0xf2b   :  { %2524 = vmatpush3.bf16.msra.mxu1 %v2523_v29 }
 0xf2c   :  { %2526 = vmatprep.subr.bf16.mxu1 %v2525_v34 }
 0xf80   :  { %v1611_v27 = vpop.permute.xlu1 %1610 }
 0xf81   :  { %v1613_v1 = vmul.f32 %v2690_v37, %v1611_v27  ;;  %v1739_v37 = vld [vmem:[%s3325_s3 + $0x48] sm:$0xff]  ;;  %v1756_v27 = vld [vmem:[%s3325_s3 + $0xd0] sm:$0xff] }
 0xf82   :  { %v2527_v39 = vpack.c.bf16 %v1739_v37, %v1738_v38 }
 0xf83   :  { %1615 = vrot.lane.b32.xlu0 %v1613_v1, %s2751_s22  ;;  %v1757_v1 = vld [vmem:[%s3325_s3 + $0xd8] sm:$0xff] }
 0xf84   :  { %v2529_v28 = vpack.c.bf16 %v1757_v1, %v1756_v27  ;;  %2528 = vmatpush3.bf16.msra.mxu1 %v2527_v39 }
 0xf86   :  { %2530 = vmatprep.subr.bf16.mxu1 %v2529_v28 }
 0xf88   :  { %2532 = vmatpush3.bf16.msra.mxu1 %v2531_v36 }
 0xf89   :  { %2534 = vmatprep.subr.bf16.mxu1 %v2533_v61 }
 0xf8c   :  { %2536 = vmatpush3.bf16.msra.mxu1 %v2535_v60 }
 0xf8d   :  { %2538 = vmatprep.subr.bf16.mxu1 %v2537_v12  ;;  %v2753_v12 = vmov 0  }
 0xf8e   :  { %2576 = vset.pattern.permute.xlu0 %v2753_v12  ;;  %2575 = vset.pattern.permute.xlu1 %v2753_v12 }
 0xf90   :  { %2540 = vmatpush3.bf16.msra.mxu1 %v2539_v18 }
 0xff5   :  { %v1616_v46 = vpop.permute.xlu0 %1615 }
 0xff6   :  { %v1618_v48 = vadd.f32 %v1616_v46, %v1608_v23  ;;  %v1651_v23 = vrot.slane %v2140_v11, %v2897_v9  ;;  %v1842_v9 = vsub.s32 %v1839_v58, %v2894_v8 }
 0xff8   :  { %2691 = vtanh.f32 %v1618_v48 }
 0xff9   :  { %2693 = vpow2.f32 %v2139_v30 }
0x1002   :  { %v2692_v6 = vpop.eup %2691 }
0x1003   :  { %1621 = vrot.lane.b32.xlu1 %v2692_v6, %s2751_s22  ;;  %v2694_v10 = vpop.eup %2693 }
0x1004   :  { %v1604_v41 = vadd.f32 1.0, %v2694_v10 }
0x1006   :  { %2695 = vrcp.f32 %v1604_v41 }
0x1010   :  { %v2696_v0 = vpop.eup %2695 }
0x1075   :  { %v1622_v47 = vpop.permute.xlu1 %1621 }
0x1076   :  { %v1624_v50 = vmul.f32 %v2696_v0, %v1622_v47 }
0x1078   :  { %2141 = vmatmul.mubr.msk.f32.vlgmr.msra.gmra.mrb[16].mxu0 %vm179_vm1, %v1624_v50 }
0x114b   :  { %v1723_v46 = vpop.f32.mrb[16].mxu0 }
0x114c   :  { %v1724_v48 = vadd.f32 %v1723_v46, %v1647_v19  ;;  %v1725_v40 = vpop.f32.mrb[17].mxu0 }
0x114d   :  { %v1726_v49 = vadd.f32 %v1725_v40, %v1651_v23 }
0x114e   :  { %v1728_v51 = vmax.f32 %v1724_v48, 0.0 }
0x114f   :  { %v1729_v44 = vmax.f32 %v1726_v49, 0.0 }
0x1151   :  { %1827 = vmatprep.mubr.f32.mxu1 %v1729_v44 }
0x1152   :  { %1828 = vmatmul.mubr.f32.vlgmr.msra.gmra.mrb[14].mxu1 %v1728_v51 }
0x1225   :  { %v2195_v57 = vpop.f32.mrb[14].mxu1 }
0x1226   :  { %v2196_v63 = vpop.f32.mrb[15].mxu1 }
0x1227   :  { %v2197_v2 = vadd.f32 %v2196_v63, %v2195_v57 }
0x1229   :  { %v1830_v4 = vadd.f32 %v2197_v2, %v1762_v59 }
0x122b   :  { %v1833_v14 = vmax.f32 %v1830_v4, 0.0 }
0x122d   :  { %v1836_v32 = vcombine.high %v1833_v14, %v1833_v14  ;;  %v1843_v15 = vrot.slane %v1833_v14, %v1842_v9 }
0x122f   :  { %v1850_v16 = vrot.slane %v1836_v32, %v1842_v9  ;;  %v1851_v21 = vcombine.high %v1843_v15, %v1843_v15  ;;  %v1859_v17 = vrot.slane %v1843_v15, %v1842_v9 }
0x1231   :  { %v1888_v24 = vrot.slane %v1859_v17, %v2932_v43  ;;  %v1873_v31 = vrot.slane %v1851_v21, %v1842_v9  ;;  %v1881_v33 = vcombine.high %v1859_v17, %v1859_v17  ;;  %v1866_v5 = vrot.slane %v1850_v16, %v1842_v9 }
0x1232   :  { %v1852_v6 = vcombine.high %v1850_v16, %v1850_v16 }
0x1233   :  { %v1925_v20 = vmul.f32 %v1888_v24, %v1834_v26  ;;  %v1892_v25 = vrot.slane %v1873_v31, %v2932_v43  ;;  %v1896_v29 = vrot.slane %v1881_v33, %v2932_v43  ;;  %v1904_v34 = vrot.slane %v1866_v5, %v2932_v43 }
0x1234   :  { %v1883_v38 = vcombine.high %v1873_v31, %v1873_v31  ;;  %v1882_v37 = vcombine.high %v1866_v5, %v1866_v5  ;;  %v1880_v28 = vrot.slane %v1852_v6, %v1842_v9 }
0x1235   :  { %v1933_v27 = vsel %vm179_vm1, %v1925_v20, 0.0  ;;  %v1926_v1 = vmul.f32 %v1892_v25, %v1834_v26  ;;  %v1927_v39 = vmul.f32 %v1896_v29, %v1834_v26  ;;  %v1929_v42 = vmul.f32 %v1904_v34, %v1834_v26 }
0x1236   :  { %1934 = vadd.xlane.f32.xlu0 %v1933_v27  ;;  %v1900_v22 = vrot.slane %v1883_v38, %v2932_v43  ;;  %v1912_v45 = vrot.slane %v1882_v37, %v2932_v43  ;;  %v1908_v30 = vrot.slane %v1880_v28, %v2932_v43  ;;  %v1884_v10 = vcombine.high %v1880_v28, %v1880_v28 }
0x1237   :  { %v1936_v55 = vsel %vm179_vm1, %v1926_v1, 0.0  ;;  %v1939_v36 = vsel %vm179_vm1, %v1927_v39, 0.0  ;;  %v1945_v41 = vsel %vm179_vm1, %v1929_v42, 0.0  ;;  %v2026_v34 = vand.u32 127, %v153_v7 }
0x1238   :  { %1937 = vadd.xlane.f32.xlu1 %v1936_v55  ;;  %v1928_v61 = vmul.f32 %v1900_v22, %v1834_v26  ;;  %v1931_v0 = vmul.f32 %v1912_v45, %v1834_v26  ;;  %v1930_v50 = vmul.f32 %v1908_v30, %v1834_v26  ;;  %v1916_v53 = vrot.slane %v1884_v10, %v2932_v43  ;;  %v1979_v43 = vld [vmem:[%s3326_s4 + $0x6] ss:$0 sm:$0xff] }
0x1239   :  { %v2029_v27 = vsub.s32 %v2026_v34, %v2894_v8 }
0x123a   :  { %1940 = vadd.xlane.f32.xlu0 %v1939_v36  ;;  %v1942_v47 = vsel %vm179_vm1, %v1928_v61, 0.0  ;;  %v1951_v56 = vsel %vm179_vm1, %v1931_v0, 0.0  ;;  %v1948_v60 = vsel %vm179_vm1, %v1930_v50, 0.0  ;;  %v1932_v35 = vmul.f32 %v1916_v53, %v1834_v26 }
0x123c   :  { %1946 = vadd.xlane.f32.xlu1 %v1945_v41  ;;  %v1954_v62 = vsel %vm179_vm1, %v1932_v35, 0.0 }
0x123e   :  { %1943 = vadd.xlane.f32.xlu0 %v1942_v47 }
0x1240   :  { %1952 = vadd.xlane.f32.xlu1 %v1951_v56 }
0x1242   :  { %1949 = vadd.xlane.f32.xlu0 %v1948_v60 }
0x1246   :  { %1955 = vadd.xlane.f32.xlu0 %v1954_v62  ;;  %v2078_v62 = vld [vmem:[%s3326_s4 + $0x5] ss:$0 sm:$0xff] }
0x1251   :  { %1960 = vbcast.lane.b32.xlu1 %v1957_v3, 256 }
0x125c   :  { %1982 = vbcast.lane.b32.xlu0 %v1979_v43, 256 }
0x12c3   :  { %v1935_v13 = vpop.xlane.xlu0 %1934 }
0x12c5   :  { %v1938_v18 = vpop.xlane.xlu1 %1937 }
0x12c7   :  { %v1941_v11 = vpop.xlane.xlu0 %1940 }
0x12c9   :  { %v1947_v19 = vpop.xlane.xlu1 %1946 }
0x12cb   :  { %v1944_v23 = vpop.xlane.xlu0 %1943 }
0x12cd   :  { %v1953_v46 = vpop.xlane.xlu1 %1952 }
0x12cf   :  { %v1950_v48 = vpop.xlane.xlu0 %1949 }
0x12d1   :  { %v1961_v40 = vpop.permute.xlu1 %1960 }
0x12d2   :  { %v1965_v49 = vadd.f32 %v1961_v40, %v1941_v11  ;;  %v1963_v44 = vadd.f32 %v1961_v40, %v1935_v13  ;;  %v1968_v57 = vadd.f32 %v1961_v40, %v1950_v48  ;;  %v1964_v58 = vadd.f32 %v1961_v40, %v1938_v18 }
0x12d3   :  { %v1956_v51 = vpop.xlane.xlu0 %1955  ;;  %v1967_v32 = vadd.f32 %v1961_v40, %v1947_v19  ;;  %v1966_v26 = vadd.f32 %v1961_v40, %v1944_v23  ;;  %v1969_v5 = vadd.f32 %v1961_v40, %v1953_v46 }
0x12d4   :  { %v1973_v52 = vmax.f32 %v1965_v49, 0.0  ;;  %v1971_v54 = vmax.f32 %v1963_v44, 0.0  ;;  %v1970_v63 = vadd.f32 %v1961_v40, %v1956_v51  ;;  %v1976_v9 = vmax.f32 %v1968_v57, 0.0 }
0x12d5   :  { %v1972_v14 = vmax.f32 %v1964_v58, 0.0  ;;  %v1975_v17 = vmax.f32 %v1967_v32, 0.0  ;;  %v1974_v33 = vmax.f32 %v1966_v26, 0.0  ;;  %v1977_v20 = vmax.f32 %v1969_v5, 0.0 }
0x12d6   :  { %v1978_v15 = vmax.f32 %v1970_v63, 0.0 }
0x12d7   :  { %v1983_v59 = vpop.permute.xlu0 %1982 }
0x12d8   :  { %v1987_v2 = vmul.f32 %v1983_v59, %v1973_v52  ;;  %v1985_v4 = vmul.f32 %v1983_v59, %v1971_v54  ;;  %v1990_v16 = vmul.f32 %v1983_v59, %v1976_v9  ;;  %v1986_v21 = vmul.f32 %v1983_v59, %v1972_v14 }
0x12d9   :  { %v1992_v24 = vmul.f32 %v1983_v59, %v1978_v15  ;;  %v1989_v31 = vmul.f32 %v1983_v59, %v1975_v17  ;;  %v1988_v6 = vmul.f32 %v1983_v59, %v1974_v33  ;;  %v1991_v25 = vmul.f32 %v1983_v59, %v1977_v20 }
0x12da   :  { %2008 = vperm.xlu0 %2576, %v1987_v2   ;;  %2002 = vperm.xlu1 %2575, %v1985_v4  }
0x12de   :  { %2017 = vperm.xlu0 %2576, %v1990_v16   ;;  %2005 = vperm.xlu1 %2575, %v1986_v21  }
0x12e2   :  { %2023 = vperm.xlu0 %2576, %v1992_v24   ;;  %2014 = vperm.xlu1 %2575, %v1989_v31  }
0x12e6   :  { %2011 = vperm.xlu1 %2575, %v1988_v6  }
0x12ea   :  { %2020 = vperm.xlu1 %2575, %v1991_v25  }
0x1359   :  { %v2003_v29 = vpop.permute.xlu1 %2002  ;;  %v2009_v38 = vpop.permute.xlu0 %2008 }
0x135a   :  { %v2030_v28 = vrot.slane %v2003_v29, %v2029_v27  ;;  %v2038_v42 = vrot.slane %v2009_v38, %v2029_v27 }
0x135d   :  { %v2006_v37 = vpop.permute.xlu1 %2005  ;;  %v2018_v22 = vpop.permute.xlu0 %2017 }
0x135e   :  { %v2034_v1 = vrot.slane %v2006_v37, %v2029_v27  ;;  %v2050_v7 = vrot.slane %v2018_v22, %v2029_v27 }
0x1360   :  { %v2060_v55 = vsel %vm2059_vm2, %v2034_v1, %v2030_v28 }
0x1361   :  { %v2015_v39 = vpop.permute.xlu1 %2014  ;;  %v2062_v30 = vsel %vm2061_vm3, %v2038_v42, %v2060_v55  ;;  %v2024_v10 = vpop.permute.xlu0 %2023 }
0x1362   :  { %v2046_v61 = vrot.slane %v2015_v39, %v2029_v27  ;;  %v2058_v53 = vrot.slane %v2024_v10, %v2029_v27 }
0x1365   :  { %v2012_v45 = vpop.permute.xlu1 %2011 }
0x1366   :  { %v2042_v36 = vrot.slane %v2012_v45, %v2029_v27 }
0x1368   :  { %v2064_v41 = vsel %vm2063_vm4, %v2042_v36, %v2062_v30 }
0x1369   :  { %v2066_v0 = vsel %vm2065_vm5, %v2046_v61, %v2064_v41  ;;  %v2021_v8 = vpop.permute.xlu1 %2020 }
0x136a   :  { %v2054_v47 = vrot.slane %v2021_v8, %v2029_v27  ;;  %v2068_v50 = vsel %vm2067_vm6, %v2050_v7, %v2066_v0 }
0x136c   :  { %v2070_v56 = vsel %vm2069_vm7, %v2054_v47, %v2068_v50 }
0x136d   :  { %v2072_v60 = vsel %vm2071_vm8, %v2058_v53, %v2070_v56 }
0x136e   :  { %v2075_v35 = vsel %vm2074_vm9, %v2072_v60, 0.0 }
0x136f   :  { %2076 = vadd.xlane.f32.xlu1 %v2075_v35 }
0x13fc   :  { %v2077_v3 = vpop.xlane.xlu1 %2076 }
0x13fd   :  { %v2079_v12 = vadd.f32 %v2078_v62, %v2077_v3 }
0x13ff   :  { %2082 = vperm.xlu0 %2576, %v2079_v12  }
0x147e   :  { %v2083_v43 = vpop.permute.xlu0 %2082 }
0x147f   :  { %2085 = vst [vmem:[#allocation6] sm:$0xff] %v2083_v43 }
0x1480   :  { %2730 = shalt.err (!%p2727_p12)
}
0x1481   :  { %s2731_s21 = scalar_lea.hbm %s3327_s5, 128 }
0x1482   :  { %p2732_p13 = scmp.ne.s32.totalorder %s3327_s5, %s2731_s21  ;;  %p2735_p0 = scmp.lt.u32.totalorder %s2731_s21, %s3327_s5 }
0x1484   :  { %p2737_p1 = pnand %p2735_p0, %p2732_p13 }
0x1486   :  { %2740 = shalt.err (!%p2737_p1)
}
0x1487   :  { %2095 = dma.vmem_to_hbm [thread:$0]  %s2093_s18, 128, %s3327_s5, [#allocation5]  }
0x1488   :  { %2743 = dma.done.wait [#allocation5], 128  }
0x1489   :  { %2744 = vsyncadd [#allocation5], 4294967168 }
0x148a   :  { %2099 = vsyncpa [#allocation4], 1 }
0x148b   :  { %2100 = vsyncpa [#allocation5], 1 }

</bundles_post_ra>
